<compile_context>
chip_gen: v6e
topology: v6e:2x2x1
jax: 0.10.0
libtpu: 0.0.40
codegen_flags: <defaults>
</compile_context>

<pallas_src>
import functools

import jax
import jax.numpy as jnp
from jax.experimental import pallas as pl
from jax.experimental.pallas import tpu as pltpu


def _round_up(n: int, m: int) -> int:
    return ((n + m - 1) // m) * m


def _itemsize(dt) -> int:
    return jnp.dtype(dt).itemsize


# ---------------------------------------------------------------------------
# Kernels
# ---------------------------------------------------------------------------

def _ae_fused_kernel(x_ref, we_ref, be_ref, wd_ref, bd_ref, o_ref):
    """Whole hidden dim resident: y = sigmoid(relu(x @ We + be) @ Wd + bd)."""
    # Cast to bf16 *inside* the kernel: HBM carries each operand once in its
    # original dtype (no wrapper cast round-trip). MXU accumulates in f32.
    x = x_ref[...].astype(jnp.bfloat16)
    we = we_ref[...].astype(jnp.bfloat16)
    h = jnp.dot(x, we, preferred_element_type=jnp.float32)
    h = jnp.maximum(h + be_ref[...], 0.0)                       # encoder ReLU (f32)
    wd = wd_ref[...].astype(jnp.bfloat16)
    y = jnp.dot(h.astype(jnp.bfloat16), wd, preferred_element_type=jnp.float32)
    o_ref[...] = jax.nn.sigmoid(y + bd_ref[...]).astype(o_ref.dtype)


def _ae_htiled_kernel(x_ref, we_ref, be_ref, wd_ref, bd_ref, o_ref, acc_ref):
    """Hidden dim tiled as a reduction grid axis. Exact, since ReLU is
    elementwise over H:  y = sigmoid(sum_h relu(x@We[:,h]+be[h]) @ Wd[h,:] + bd)."""
    hi = pl.program_id(1)

    @pl.when(hi == 0)
    def _():
        acc_ref[...] = jnp.zeros_like(acc_ref)

    x = x_ref[...].astype(jnp.bfloat16)
    we = we_ref[...].astype(jnp.bfloat16)
    h = jnp.dot(x, we, preferred_element_type=jnp.float32)
    h = jnp.maximum(h + be_ref[...], 0.0)
    wd = wd_ref[...].astype(jnp.bfloat16)
    acc_ref[...] += jnp.dot(h.astype(jnp.bfloat16), wd,
                            preferred_element_type=jnp.float32)

    @pl.when(hi == pl.num_programs(1) - 1)
    def _():
        o_ref[...] = jax.nn.sigmoid(acc_ref[...] + bd_ref[...]).astype(o_ref.dtype)


# ---------------------------------------------------------------------------
# Generation-aware planning
# ---------------------------------------------------------------------------

def _tpu_budget():
    """Returns (vmem_limit_bytes, tensorcores_per_chip) with safe fallbacks."""
    vmem_cap = 64 * 1024 * 1024          # conservative (v7x) fallback
    cores = 1
    try:
        info = pltpu.get_tpu_info()
        cap = int(getattr(info, "vmem_capacity_bytes", 0) or 0)
        if 16 * 1024 * 1024 <= cap <= 1024 * 1024 * 1024:
            vmem_cap = cap
        for name in ("tensorcores_per_chip", "num_tensorcores",
                     "tensor_core_count", "num_cores", "core_count"):
            v = getattr(info, name, None)
            if isinstance(v, int) and 1 <= v <= 8:
                cores = v
                break
    except Exception:
        pass
    # ~80% of physical (≈100 MiB on v5e/v6e, ≈51 MiB on v7x), 2 MiB headroom.
    limit = min(vmem_cap - 2 * 1024 * 1024,
                max(32 * 1024 * 1024, int(vmem_cap * 0.80)))
    return limit, cores


def _choose_bb(B, cap_bb, min_steps):
    """Batch tile: full-array block when it fits; otherwise prefer a divisor of B
    (pad and out[:B] slice become no-ops); keep >= min_steps steps on multi-TC chips."""
    cap_bb = max(16, (cap_bb // 16) * 16)
    if B <= cap_bb and (min_steps <= 1 or B <= 16 * min_steps):
        return B, B                                      # single full-dim block, no padding
    target = min(cap_bb, _round_up(-(-B // max(min_steps, 1)), 16))
    target = max(16, (target // 16) * 16)
    for d in range(target, 15, -16):                     # largest divisor of B, multiple of 16
        if B % d == 0:
            return d, B
    steps = -(-B // target)                              # minimal padding fallback
    bb = max(16, _round_up(-(-B // steps), 16))
    return bb, _round_up(B, bb)


# ---------------------------------------------------------------------------
# Forward pass
# ---------------------------------------------------------------------------

@functools.partial(jax.jit, static_argnames=("block_b", "out_dtype", "h_block"))
def _autoencoder_forward_2d(x2, w_enc, b_enc, w_dec, b_dec, *,
                            block_b, out_dtype, h_block):
    B, D = x2.shape
    H = w_enc.shape[1]
    b_enc = b_enc.reshape(1, H).astype(jnp.float32)
    b_dec = b_dec.reshape(1, D).astype(jnp.float32)

    vmem_limit, cores = _tpu_budget()
    budget = int(vmem_limit * 0.85)                      # slack for compiler temporaries
    min_steps = 2 * cores if cores > 1 else 1            # >=2 steps per TC only on multi-TC

    # Lane-dense feature axes: pad D/H to multiples of 128 (no-op when aligned).
    D_pad, H_pad = _round_up(D, 128), _round_up(H, 128)
    if D_pad != D or H_pad != H:
        w_enc = jnp.pad(w_enc, ((0, D_pad - D), (0, H_pad - H)))
        w_dec = jnp.pad(w_dec, ((0, H_pad - H), (0, D_pad - D)))
    if H_pad != H:
        b_enc = jnp.pad(b_enc, ((0, 0), (0, H_pad - H)))
    if D_pad != D:
        b_dec = jnp.pad(b_dec, ((0, 0), (0, D_pad - D)))
        x2 = jnp.pad(x2, ((0, 0), (0, D_pad - D)))

    x_sz, w_sz, o_sz = _itemsize(x2.dtype), _itemsize(w_enc.dtype), _itemsize(out_dtype)

    # VMEM budget: resident weights + per-batch-row tile/scratch bytes.
    resident_w = 2 * D_pad * H_pad * w_sz + (H_pad + D_pad) * 4
    per_row = (2 * D_pad * x_sz            # x tile, double-buffered
               + 2 * D_pad * o_sz          # out tile, double-buffered
               + H_pad * (4 + 2)           # f32 hidden + its bf16 copy
               + D_pad * 2)                # bf16 copy of x
    cap_bb = (budget - resident_w) // per_row if budget > resident_w else 0
    cap_bb = min(cap_bb, 1024)             # measured sweet spot; keeps pipelining for big B
    if block_b is not None:
        cap_bb = min(cap_bb, block_b)
    use_htile = (h_block is not None) or (resident_w > int(0.7 * budget)) \
        or (cap_bb < 16 and cap_bb < B)

    resident = pl.Buffered(1)              # constant-index blocks: single-buffered / resident

    if not use_htile:
        bb, B_pad = _choose_bb(B, max(16, cap_bb), min_steps)
        grid = (B_pad // bb,)
        in_specs = [
            pl.BlockSpec((bb, D_pad), lambda i: (i, 0)),                             # x tile
            pl.BlockSpec((D_pad, H_pad), lambda i: (0, 0), pipeline_mode=resident),  # W_enc
            pl.BlockSpec((1, H_pad), lambda i: (0, 0), pipeline_mode=resident),      # b_enc
            pl.BlockSpec((H_pad, D_pad), lambda i: (0, 0), pipeline_mode=resident),  # W_dec
            pl.BlockSpec((1, D_pad), lambda i: (0, 0), pipeline_mode=resident),      # b_dec
        ]
        out_spec = pl.BlockSpec((bb, D_pad), lambda i: (i, 0))
        scratch = []
        kernel = _ae_fused_kernel
        dims = ("parallel",)
    else:
        # Resident weights don't fit (e.g. large D/H on v7x's 64 MiB VMEM): tile H.
        bb_target = block_b if block_b is not None else 256
        bb, B_pad = _choose_bb(B, max(16, bb_target), min_steps)
        fixed = bb * (2 * D_pad * x_sz + 2 * D_pad * o_sz + D_pad * 4 + D_pad * 2) \
            + D_pad * 4
        per_th = 4 * D_pad * w_sz + bb * 6 + 8           # We col + Wd row (x2 bufs) + hidden
        if h_block is not None:
            th_cap = min(h_block, H_pad)
        else:
            th_cap = max(0, budget - fixed) // per_th
        th_cap = max(128, min(H_pad, (th_cap // 128) * 128))
        th = 128
        for cand in range(th_cap, 127, -128):            # largest 128-multiple dividing H_pad
            if H_pad % cand == 0:
                th = cand
                break
        grid = (B_pad // bb, H_pad // th)
        in_specs = [
            pl.BlockSpec((bb, D_pad), lambda i, h: (i, 0)),                          # x tile
            pl.BlockSpec((D_pad, th), lambda i, h: (0, h)),                          # W_enc[:, h]
            pl.BlockSpec((1, th), lambda i, h: (0, h)),                              # b_enc[h]
            pl.BlockSpec((th, D_pad), lambda i, h: (h, 0)),                          # W_dec[h, :]
            pl.BlockSpec((1, D_pad), lambda i, h: (0, 0), pipeline_mode=resident),   # b_dec
        ]
        out_spec = pl.BlockSpec((bb, D_pad), lambda i, h: (i, 0))
        scratch = [pltpu.VMEM((bb, D_pad), jnp.float32)]
        kernel = _ae_htiled_kernel
        dims = ("parallel", "arbitrary")

    if B_pad != B:
        x2 = jnp.pad(x2, ((0, B_pad - B), (0, 0)))

    cost = pl.CostEstimate(
        flops=4 * B_pad * D_pad * H_pad,                 # two matmuls
        transcendentals=B_pad * D_pad,                   # sigmoid exp
        bytes_accessed=(B_pad * D_pad * (x_sz + o_sz)
                        + 2 * D_pad * H_pad * w_sz
                        + (H_pad + D_pad) * 4),
    )

    out = pl.pallas_call(
        kernel,
        out_shape=jax.ShapeDtypeStruct((B_pad, D_pad), out_dtype),
        grid=grid,
        in_specs=in_specs,
        out_specs=out_spec,
        scratch_shapes=scratch,
        compiler_params=pltpu.CompilerParams(
            dimension_semantics=dims,
            vmem_limit_bytes=vmem_limit,
        ),
        cost_estimate=cost,
    )(x2, w_enc, b_enc, w_dec, b_dec)

    if B_pad != B or D_pad != D:
        out = out[:B, :D]
    return out


def autoencoder_forward(x, w_enc, b_enc, w_dec, b_dec, *, block_b=None,
                        out_dtype=jnp.bfloat16, h_block=None):
    """Forward pass matching AutoencoderBase.forward with
    encoder = Linear(D, H) + ReLU, decoder = Linear(H, D) + Sigmoid.

    x: (D,), (B, D) or (B, C, D).  w_enc: (D, H) (= torch weight.T), w_dec: (H, D).
    Output is bf16 by default (HBM-bound kernel); pass out_dtype=jnp.float32 for
    the exact torch dtype.
    """
    D = x.shape[-1]
    x2 = x.reshape(-1, D)
    out = _autoencoder_forward_2d(x2, w_enc, b_enc, w_dec, b_dec,
                                  block_b=block_b, out_dtype=out_dtype,
                                  h_block=h_block)
    if x.ndim <= 2:
        # 1-D: torch returns (1, D) ((1,1,D).squeeze(1)); 2-D: (B, D).
        return out
    out = out.reshape(x.shape)
    if out.shape[1] == 1:
        out = jnp.squeeze(out, axis=1)                   # .squeeze(1)
    return out


def _torch_linear_init(key, fan_in, shape):
    # Deterministic stand-in for nn.Linear default init: U(-1/sqrt(fan_in), +).
    bound = 1.0 / (fan_in ** 0.5)
    return jax.random.uniform(key, shape, jnp.float32, -bound, bound)


if __name__ == "__main__":
    key = jax.random.PRNGKey(0)
    k_x, k_we, k_be, k_wd, k_bd = jax.random.split(key, 5)

    # Small, MXU/lane-aligned shapes.
    B, D, H = 256, 256, 256

    x = jax.random.normal(k_x, (B, D), jnp.float32)
    w_enc = _torch_linear_init(k_we, D, (D, H))          # Linear(D, H).weight.T
    b_enc = _torch_linear_init(k_be, D, (H,))            # Linear(D, H).bias
    w_dec = _torch_linear_init(k_wd, H, (H, D))          # Linear(H, D).weight.T
    b_dec = _torch_linear_init(k_bd, H, (D,))            # Linear(H, D).bias

    # Reference with the same bf16 operand rounding, f32 accumulation.
    xb = x.astype(jnp.bfloat16).astype(jnp.float32)
    web = w_enc.astype(jnp.bfloat16).astype(jnp.float32)
    wdb = w_dec.astype(jnp.bfloat16).astype(jnp.float32)
    h_ref = jnp.maximum(xb @ web + b_enc[None, :], 0.0)
    hb = h_ref.astype(jnp.bfloat16).astype(jnp.float32)
    y_ref = jax.nn.sigmoid(hb @ wdb + b_dec[None, :])

    # Fused path (weights resident in VMEM).
    y = autoencoder_forward(x, w_enc, b_enc, w_dec, b_dec)
    y = jax.block_until_ready(y)
    assert y.shape == (B, D), y.shape
    assert jnp.max(jnp.abs(y.astype(jnp.float32) - y_ref)) < 1e-2, "fused path mismatch"

    # H-tiled reduction path (auto-selected when weights exceed the VMEM budget;
    # forced here at a small shape to exercise it).
    y2 = autoencoder_forward(x, w_enc, b_enc, w_dec, b_dec, h_block=128)
    y2 = jax.block_until_ready(y2)
    assert jnp.max(jnp.abs(y2.astype(jnp.float32) - y_ref)) < 1e-2, "h-tiled path mismatch"

    # (B, 1, D) channel input: matches torch _ensure_batch_and_channel + squeeze(1).
    y3 = autoencoder_forward(x[:, None, :], w_enc, b_enc, w_dec, b_dec)
    assert jax.block_until_ready(y3).shape == (B, D)

    # TODO(synk): train_model / evaluate / TensorBoard logging / checkpoint save-load /
    # plotting are host-side orchestration with no Pallas equivalent.
    print("KERNEL_OK")
</pallas_src>

<mosaic_0001>
module attributes {stable_mosaic.version = 11 : i64} {
  func.func @_ae_fused_kernel(%arg0: i32, %arg1: memref<256x256xf32, #tpu.memory_space<vmem>>, %arg2: memref<256x256xf32, #tpu.memory_space<vmem>>, %arg3: memref<1x256xf32, #tpu.memory_space<vmem>>, %arg4: memref<256x256xf32, #tpu.memory_space<vmem>>, %arg5: memref<1x256xf32, #tpu.memory_space<vmem>>, %arg6: memref<256x256xbf16, #tpu.memory_space<vmem>>) attributes {dimension_semantics = [#tpu.dimension_semantics<parallel>], iteration_bounds = array<i64: 1>, scalar_prefetch = 0 : i64, scratch_operands = 0 : i64, tpu.core_type = #tpu.core_type<tc>, window_params = [{transform_indices = @transform_0, window_bounds = array<i64: 256, 256>}, {pipeline_mode = #tpu.pipeline_mode<synchronous>, transform_indices = @transform_1, window_bounds = array<i64: 256, 256>}, {pipeline_mode = #tpu.pipeline_mode<synchronous>, transform_indices = @transform_2, window_bounds = array<i64: 1, 256>}, {pipeline_mode = #tpu.pipeline_mode<synchronous>, transform_indices = @transform_3, window_bounds = array<i64: 256, 256>}, {pipeline_mode = #tpu.pipeline_mode<synchronous>, transform_indices = @transform_4, window_bounds = array<i64: 1, 256>}, {transform_indices = @transform_5, window_bounds = array<i64: 256, 256>}]} {
    %c0 = arith.constant 0 : index
    %c0_0 = arith.constant 0 : index
    %0 = vector.load %arg1[%c0, %c0_0] : memref<256x256xf32, #tpu.memory_space<vmem>>, vector<256x256xf32>
    %1 = arith.truncf %0 : vector<256x256xf32> to vector<256x256xbf16>
    %c0_1 = arith.constant 0 : index
    %c0_2 = arith.constant 0 : index
    %2 = vector.load %arg2[%c0_1, %c0_2] : memref<256x256xf32, #tpu.memory_space<vmem>>, vector<256x256xf32>
    %3 = arith.truncf %2 : vector<256x256xf32> to vector<256x256xbf16>
    %cst = arith.constant dense<0.000000e+00> : vector<256x256xf32>
    %4 = tpu.matmul %1, %3, %cst {dimension_numbers = #tpu.dot_dimension_numbers<[1], [0], [0], [1], [0, 0, 1, 1], [], []>} : vector<256x256xbf16>, vector<256x256xbf16>, vector<256x256xf32> -> vector<256x256xf32>
    %c0_3 = arith.constant 0 : index
    %c0_4 = arith.constant 0 : index
    %5 = vector.load %arg3[%c0_3, %c0_4] : memref<1x256xf32, #tpu.memory_space<vmem>>, vector<1x256xf32>
    %6 = vector.broadcast %5 : vector<1x256xf32> to vector<256x256xf32>
    %7 = arith.addf %4, %6 : vector<256x256xf32>
    %cst_5 = arith.constant 0.000000e+00 : f32
    %8 = vector.broadcast %cst_5 : f32 to vector<256x256xf32>
    %9 = arith.maximumf %7, %8 : vector<256x256xf32>
    %c0_6 = arith.constant 0 : index
    %c0_7 = arith.constant 0 : index
    %10 = vector.load %arg4[%c0_6, %c0_7] : memref<256x256xf32, #tpu.memory_space<vmem>>, vector<256x256xf32>
    %11 = arith.truncf %10 : vector<256x256xf32> to vector<256x256xbf16>
    %12 = arith.truncf %9 : vector<256x256xf32> to vector<256x256xbf16>
    %cst_8 = arith.constant dense<0.000000e+00> : vector<256x256xf32>
    %13 = tpu.matmul %12, %11, %cst_8 {dimension_numbers = #tpu.dot_dimension_numbers<[1], [0], [0], [1], [0, 0, 1, 1], [], []>} : vector<256x256xbf16>, vector<256x256xbf16>, vector<256x256xf32> -> vector<256x256xf32>
    %c0_9 = arith.constant 0 : index
    %c0_10 = arith.constant 0 : index
    %14 = vector.load %arg5[%c0_9, %c0_10] : memref<1x256xf32, #tpu.memory_space<vmem>>, vector<1x256xf32>
    %15 = vector.broadcast %14 : vector<1x256xf32> to vector<256x256xf32>
    %16 = arith.addf %13, %15 : vector<256x256xf32>
    %17 = arith.negf %16 : vector<256x256xf32>
    %18 = math.exp %17 : vector<256x256xf32>
    %cst_11 = arith.constant 1.000000e+00 : f32
    %19 = vector.broadcast %cst_11 : f32 to vector<256x256xf32>
    %20 = arith.addf %19, %18 : vector<256x256xf32>
    %21 = arith.divf %19, %20 : vector<256x256xf32>
    %22 = arith.truncf %21 : vector<256x256xf32> to vector<256x256xbf16>
    %c0_12 = arith.constant 0 : index
    %c0_13 = arith.constant 0 : index
    %23 = vector.load %arg6[%c0_12, %c0_13] : memref<256x256xbf16, #tpu.memory_space<vmem>>, vector<256x256xbf16>
    tpu.vector_store %arg6[%c0_12, %c0_13], %22 {strides = array<i32>} : memref<256x256xbf16, #tpu.memory_space<vmem>>, vector<256x256xbf16>,
    return
  }
  func.func @transform_0(%arg0: i32) -> (i32, i32) {
    %c0_i32 = arith.constant 0 : i32
    %c0_i32_0 = arith.constant 0 : i32
    return %arg0, %c0_i32 : i32, i32
  }
  func.func @transform_1(%arg0: i32) -> (i32, i32) {
    %c0_i32 = arith.constant 0 : i32
    %c0_i32_0 = arith.constant 0 : i32
    %c0_i32_1 = arith.constant 0 : i32
    return %c0_i32, %c0_i32_0 : i32, i32
  }
  func.func @transform_2(%arg0: i32) -> (i32, i32) {
    %c0_i32 = arith.constant 0 : i32
    %c0_i32_0 = arith.constant 0 : i32
    %c0_i32_1 = arith.constant 0 : i32
    return %c0_i32, %c0_i32_0 : i32, i32
  }
  func.func @transform_3(%arg0: i32) -> (i32, i32) {
    %c0_i32 = arith.constant 0 : i32
    %c0_i32_0 = arith.constant 0 : i32
    %c0_i32_1 = arith.constant 0 : i32
    return %c0_i32, %c0_i32_0 : i32, i32
  }
  func.func @transform_4(%arg0: i32) -> (i32, i32) {
    %c0_i32 = arith.constant 0 : i32
    %c0_i32_0 = arith.constant 0 : i32
    %c0_i32_1 = arith.constant 0 : i32
    return %c0_i32, %c0_i32_0 : i32, i32
  }
  func.func @transform_5(%arg0: i32) -> (i32, i32) {
    %c0_i32 = arith.constant 0 : i32
    %c0_i32_0 = arith.constant 0 : i32
    return %arg0, %c0_i32 : i32, i32
  }
}

</mosaic_0001>

<bundles_post_ra>
// kernel: _autoencoder_forward_2d.1
= control target key start
LH: loop header
LB: loop body
LE: loop exit
PB: predicated region body
PF: predicated region fallthrough
CT: control target
= control target key end

     0   :  { %10 = vsyncpa [#allocation3], 0  ;;  %s2164_s0 = inlined_call_operand.hbm [shape: f32[256,256], index: 0, kind: input, shape index: {}]   ;;  %s2165_s1 = inlined_call_operand.hbm [shape: f32[256,256], index: 1, kind: input, shape index: {}]   ;;  %s2166_s2 = inlined_call_operand.vmem [shape: f32[1,256], index: 2, kind: input, shape index: {}]   ;;  %s2167_s3 = inlined_call_operand.hbm [shape: f32[256,256], index: 3, kind: input, shape index: {}]   ;;  %s2168_s4 = inlined_call_operand.vmem [shape: f32[1,256], index: 4, kind: input, shape index: {}]   ;;  %s2169_s5 = inlined_call_operand.hbm [shape: bf16[256,256], index: 5, kind: output, shape index: {}]  }
   0x1   :  { %11 = vsyncpa [#allocation6], 0 }
   0x2   :  { %12 = vsyncpa [#allocation4], 0  ;;  %s1960_s18 = smov [#allocation5]   ;;  %s1961_s20 = smov [#allocation2]  }
   0x3   :  { %s30_s19 = sshll.u32 %s1960_s18, 4  ;;  %s18_s21 = sshll.u32 %s1961_s20, 4  ;;  %s31_s19 = int_to_ptr.vmem [resolvable:$true] %s30_s19  ;;  %s19_s21 = int_to_ptr.vmem [resolvable:$true] %s18_s21 }
   0x4   :  { %s1882_s22 = scalar_lea.vmem %s31_s19, 8192  ;;  %p1887_p1 = scmp.lt.s32.totalorder %s31_s19, %s31_s19 }
   0x5   :  { %p1883_p0 = scmp.ne.s32.totalorder %s31_s19, %s1882_s22  ;;  %p1888_p2 = scmp.lt.s32.totalorder %s1882_s22, %s1882_s22 }
   0x7   :  { %p1889_p3 = por %p1888_p2, %p1887_p1 }
   0x9   :  { %p1890_p4 = pnand %p1889_p3, %p1883_p0 }
   0xb   :  { %1893 = shalt.err (!%p1890_p4)
}
   0xc   :  { %s1962_s23 = smov 256   ;;  %s1963_s24 = smov 16  }
   0xd   :  { %36 = dma.hbm_to_vmem [thread:$0]  %s2165_s1, 8192, %s31_s19, [#allocation6], %s1962_s23, %s1962_s23, %s1963_s24  }
   0xe   :  { %s1902_s27 = scalar_lea.vmem %s19_s21, 8192  ;;  %p1907_p6 = scmp.lt.s32.totalorder %s19_s21, %s19_s21 }
   0xf   :  { %p1903_p5 = scmp.ne.s32.totalorder %s19_s21, %s1902_s27  ;;  %p1908_p7 = scmp.lt.s32.totalorder %s1902_s27, %s1902_s27 }
  0x11   :  { %p1909_p8 = por %p1908_p7, %p1907_p6 }
  0x13   :  { %p1910_p9 = pnand %p1909_p8, %p1903_p5 }
  0x15   :  { %1913 = shalt.err (!%p1910_p9)
}
  0x16   :  { %24 = dma.hbm_to_vmem [thread:$0]  %s2164_s0, 8192, %s19_s21, [#allocation3], %s1962_s23, %s1962_s23, %s1963_s24  }
  0x17   :  { %s1964_s30 = smov [#allocation7]  }
  0x18   :  { %s44_s6 = sshll.u32 %s1964_s30, 4  ;;  %s45_s6 = int_to_ptr.vmem [resolvable:$true] %s44_s6 }
  0x19   :  { %s1922_s7 = scalar_lea.vmem %s45_s6, 8192  ;;  %p1927_p11 = scmp.lt.s32.totalorder %s45_s6, %s45_s6 }
  0x1a   :  { %p1923_p10 = scmp.ne.s32.totalorder %s45_s6, %s1922_s7  ;;  %p1928_p12 = scmp.lt.s32.totalorder %s1922_s7, %s1922_s7 }
  0x1c   :  { %p1929_p13 = por %p1928_p12, %p1927_p11 }
  0x1e   :  { %p1930_p0 = pnand %p1929_p13, %p1923_p10 }
  0x20   :  { %1933 = shalt.err (!%p1930_p0)
}
  0x21   :  { %50 = dma.hbm_to_vmem [thread:$0]  %s2167_s3, 8192, %s45_s6, [#allocation6], %s1962_s23, %s1962_s23, %s1963_s24  }
  0x22   :  { %1954 = dma.done.wait [#allocation3], 8192  }
  0x23   :  { %1955 = vsyncadd [#allocation3], 4294959104 }
  0x24   :  { %1956 = dma.done.wait [#allocation6], 16384  }
  0x25   :  { %1957 = vsyncadd [#allocation6], 4294950912  ;;  %v187_v0 = vld [vmem:[#allocation5 + $0xe8] sm:$0xff]  ;;  %v189_v1 = vld [vmem:[#allocation5 + $0xf8] sm:$0xff] }
  0x26   :  { %v186_v2 = vld [vmem:[#allocation5 + $0xe0] sm:$0xff]  ;;  %v237_v3 = vpack.c.bf16 %v189_v1, %v187_v0  ;;  %v188_v4 = vld [vmem:[#allocation5 + $0xf0] sm:$0xff]  ;;  %v183_v5 = vld [vmem:[#allocation5 + $0xc8] sm:$0xff] }
  0x27   :  { %v185_v6 = vld [vmem:[#allocation5 + $0xd8] sm:$0xff]  ;;  %v236_v7 = vpack.c.bf16 %v188_v4, %v186_v2  ;;  %v182_v9 = vld [vmem:[#allocation5 + $0xc0] sm:$0xff]  ;;  %v184_v10 = vld [vmem:[#allocation5 + $0xd0] sm:$0xff] }
  0x28   :  { %v235_v8 = vpack.c.bf16 %v185_v6, %v183_v5  ;;  %v179_v11 = vld [vmem:[#allocation5 + $0xa8] sm:$0xff]  ;;  %266 = vmatprep.subr.bf16.mxu0 %v237_v3  ;;  %v181_v12 = vld [vmem:[#allocation5 + $0xb8] sm:$0xff]  ;;  %v234_v13 = vpack.c.bf16 %v184_v10, %v182_v9  ;;  %v178_v15 = vld [vmem:[#allocation5 + $0xa0] sm:$0xff] }
  0x29   :  { %267 = vmatpush1.bf16.msra.mxu0 %v236_v7  ;;  %v233_v14 = vpack.c.bf16 %v181_v12, %v179_v11  ;;  %v180_v16 = vld [vmem:[#allocation5 + $0xb0] sm:$0xff]  ;;  %v175_v17 = vld [vmem:[#allocation5 + $0x88] sm:$0xff]  ;;  %v177_v18 = vld [vmem:[#allocation5 + $0x98] sm:$0xff] }
  0x2a   :  { %268 = vmatprep.subr.bf16.mxu0 %v235_v8  ;;  %v232_v19 = vpack.c.bf16 %v180_v16, %v178_v15  ;;  %v231_v20 = vpack.c.bf16 %v177_v18, %v175_v17  ;;  %v174_v21 = vld [vmem:[#allocation5 + $0x80] sm:$0xff]  ;;  %v176_v22 = vld [vmem:[#allocation5 + $0x90] sm:$0xff]  ;;  %v171_v23 = vld [vmem:[#allocation5 + $0x68] sm:$0xff] }
  0x2b   :  { %v173_v24 = vld [vmem:[#allocation5 + $0x78] sm:$0xff]  ;;  %v230_v25 = vpack.c.bf16 %v176_v22, %v174_v21  ;;  %v170_v27 = vld [vmem:[#allocation5 + $0x60] sm:$0xff]  ;;  %v172_v28 = vld [vmem:[#allocation5 + $0x70] sm:$0xff] }
  0x2c   :  { %v229_v26 = vpack.c.bf16 %v173_v24, %v171_v23  ;;  %v167_v29 = vld [vmem:[#allocation5 + $0x48] sm:$0xff]  ;;  %v169_v30 = vld [vmem:[#allocation5 + $0x58] sm:$0xff]  ;;  %v228_v31 = vpack.c.bf16 %v172_v28, %v170_v27  ;;  %v166_v33 = vld [vmem:[#allocation5 + $0x40] sm:$0xff] }
  0x2d   :  { %269 = vmatpush1.bf16.msra.mxu0 %v234_v13  ;;  %v227_v32 = vpack.c.bf16 %v169_v30, %v167_v29  ;;  %v168_v34 = vld [vmem:[#allocation5 + $0x50] sm:$0xff]  ;;  %v163_v35 = vld [vmem:[#allocation5 + $0x28] sm:$0xff]  ;;  %v165_v36 = vld [vmem:[#allocation5 + $0x38] sm:$0xff] }
  0x2e   :  { %270 = vmatprep.subr.bf16.mxu0 %v233_v14  ;;  %v226_v37 = vpack.c.bf16 %v168_v34, %v166_v33  ;;  %v162_v38 = vld [vmem:[#allocation5 + $0x20] sm:$0xff]  ;;  %v225_v39 = vpack.c.bf16 %v165_v36, %v163_v35  ;;  %v164_v40 = vld [vmem:[#allocation5 + $0x30] sm:$0xff]  ;;  %v63_v41 = vld [vmem:[#allocation2 + $0x8] sm:$0xff] }
  0x2f   :  { %v65_v42 = vld [vmem:[#allocation2 + $0x18] sm:$0xff]  ;;  %v159_v43 = vld [vmem:[#allocation5 + $0x8] sm:$0xff]  ;;  %v224_v46 = vpack.c.bf16 %v164_v40, %v162_v38  ;;  %v158_v48 = vld [vmem:[#allocation5] sm:$0xff] }
  0x30   :  { %v161_v44 = vld [vmem:[#allocation5 + $0x18] sm:$0xff]  ;;  %v127_v45 = vpack.c.bf16 %v65_v42, %v63_v41  ;;  %v160_v49 = vld [vmem:[#allocation5 + $0x10] sm:$0xff]  ;;  %v219_v50 = vld [vmem:[#allocation5 + $0x1e8] sm:$0xff] }
  0x31   :  { %271 = vmatpush1.bf16.msra.mxu0 %v232_v19  ;;  %v223_v47 = vpack.c.bf16 %v161_v44, %v159_v43  ;;  %v221_v51 = vld [vmem:[#allocation5 + $0x1f8] sm:$0xff]  ;;  %v222_v52 = vpack.c.bf16 %v160_v49, %v158_v48  ;;  %v218_v54 = vld [vmem:[#allocation5 + $0x1e0] sm:$0xff]  ;;  %v220_v55 = vld [vmem:[#allocation5 + $0x1f0] sm:$0xff] }
  0x32   :  { %272 = vmatprep.subr.bf16.mxu0 %v231_v20  ;;  %298 = vmatprep.mubr.bf16.mxu0 %v127_v45  ;;  %v253_v53 = vpack.c.bf16 %v221_v51, %v219_v50  ;;  %v215_v56 = vld [vmem:[#allocation5 + $0x1c8] sm:$0xff]  ;;  %v217_v57 = vld [vmem:[#allocation5 + $0x1d8] sm:$0xff]  ;;  %v252_v58 = vpack.c.bf16 %v220_v55, %v218_v54  ;;  %v214_v60 = vld [vmem:[#allocation5 + $0x1c0] sm:$0xff] }
  0x33   :  { %v251_v59 = vpack.c.bf16 %v217_v57, %v215_v56  ;;  %v216_v61 = vld [vmem:[#allocation5 + $0x1d0] sm:$0xff]  ;;  %v211_v62 = vld [vmem:[#allocation5 + $0x1a8] sm:$0xff]  ;;  %v213_v63 = vld [vmem:[#allocation5 + $0x1b8] sm:$0xff] }
  0x34   :  { %v250_v0 = vpack.c.bf16 %v216_v61, %v214_v60  ;;  %v249_v1 = vpack.c.bf16 %v213_v63, %v211_v62  ;;  %v210_v2 = vld [vmem:[#allocation5 + $0x1a0] sm:$0xff]  ;;  %v212_v3 = vld [vmem:[#allocation5 + $0x1b0] sm:$0xff]  ;;  %v207_v4 = vld [vmem:[#allocation5 + $0x188] sm:$0xff] }
  0x35   :  { %273 = vmatpush1.bf16.msra.mxu0 %v230_v25  ;;  %v209_v5 = vld [vmem:[#allocation5 + $0x198] sm:$0xff]  ;;  %v248_v6 = vpack.c.bf16 %v212_v3, %v210_v2  ;;  %v206_v8 = vld [vmem:[#allocation5 + $0x180] sm:$0xff]  ;;  %v208_v9 = vld [vmem:[#allocation5 + $0x190] sm:$0xff] }
  0x36   :  { %274 = vmatprep.subr.bf16.mxu0 %v229_v26  ;;  %v247_v7 = vpack.c.bf16 %v209_v5, %v207_v4  ;;  %v203_v10 = vld [vmem:[#allocation5 + $0x168] sm:$0xff]  ;;  %v205_v11 = vld [vmem:[#allocation5 + $0x178] sm:$0xff]  ;;  %v246_v12 = vpack.c.bf16 %v208_v9, %v206_v8  ;;  %v202_v14 = vld [vmem:[#allocation5 + $0x160] sm:$0xff] }
  0x37   :  { %v245_v13 = vpack.c.bf16 %v205_v11, %v203_v10  ;;  %v204_v15 = vld [vmem:[#allocation5 + $0x170] sm:$0xff]  ;;  %v199_v16 = vld [vmem:[#allocation5 + $0x148] sm:$0xff]  ;;  %v201_v17 = vld [vmem:[#allocation5 + $0x158] sm:$0xff] }
  0x38   :  { %v244_v18 = vpack.c.bf16 %v204_v15, %v202_v14  ;;  %v243_v19 = vpack.c.bf16 %v201_v17, %v199_v16  ;;  %v198_v20 = vld [vmem:[#allocation5 + $0x140] sm:$0xff]  ;;  %v200_v21 = vld [vmem:[#allocation5 + $0x150] sm:$0xff]  ;;  %v195_v22 = vld [vmem:[#allocation5 + $0x128] sm:$0xff] }
  0x39   :  { %275 = vmatpush1.bf16.msra.mxu0 %v228_v31  ;;  %v197_v23 = vld [vmem:[#allocation5 + $0x138] sm:$0xff]  ;;  %v242_v24 = vpack.c.bf16 %v200_v21, %v198_v20  ;;  %v194_v26 = vld [vmem:[#allocation5 + $0x120] sm:$0xff]  ;;  %v196_v27 = vld [vmem:[#allocation5 + $0x130] sm:$0xff] }
  0x3a   :  { %276 = vmatprep.subr.bf16.mxu0 %v227_v32  ;;  %v241_v25 = vpack.c.bf16 %v197_v23, %v195_v22  ;;  %v191_v28 = vld [vmem:[#allocation5 + $0x108] sm:$0xff]  ;;  %v193_v29 = vld [vmem:[#allocation5 + $0x118] sm:$0xff]  ;;  %v240_v30 = vpack.c.bf16 %v196_v27, %v194_v26  ;;  %v190_v32 = vld [vmem:[#allocation5 + $0x100] sm:$0xff] }
  0x3b   :  { %v239_v31 = vpack.c.bf16 %v193_v29, %v191_v28  ;;  %v192_v33 = vld [vmem:[#allocation5 + $0x110] sm:$0xff]  ;;  %v62_v34 = vld [vmem:[#allocation2] sm:$0xff]  ;;  %v67_v36 = vld [vmem:[#allocation2 + $0x28] sm:$0xff] }
  0x3c   :  { %v64_v35 = vld [vmem:[#allocation2 + $0x10] sm:$0xff]  ;;  %v552_v38 = vld [vmem:[#allocation7 + $0xe8] sm:$0xff]  ;;  %v551_v40 = vld [vmem:[#allocation7 + $0xe0] sm:$0xff]  ;;  %v238_v41 = vpack.c.bf16 %v192_v33, %v190_v32 }
  0x3d   :  { %277 = vmatpush1.bf16.msra.mxu0 %v226_v37  ;;  %v69_v37 = vld [vmem:[#allocation2 + $0x38] sm:$0xff]  ;;  %v553_v43 = vld [vmem:[#allocation7 + $0xf0] sm:$0xff]  ;;  %v548_v44 = vld [vmem:[#allocation7 + $0xc8] sm:$0xff] }
  0x3e   :  { %278 = vmatprep.subr.bf16.mxu0 %v225_v39  ;;  %v554_v39 = vld [vmem:[#allocation7 + $0xf8] sm:$0xff]  ;;  %v547_v48 = vld [vmem:[#allocation7 + $0xc0] sm:$0xff]  ;;  %v549_v49 = vld [vmem:[#allocation7 + $0xd0] sm:$0xff]  ;;  %v129_v54 = vpack.c.bf16 %v69_v37, %v67_v36 }
  0x3f   :  { %v602_v42 = vpack.c.bf16 %v554_v39, %v552_v38  ;;  %v550_v45 = vld [vmem:[#allocation7 + $0xd8] sm:$0xff]  ;;  %v544_v50 = vld [vmem:[#allocation7 + $0xa8] sm:$0xff]  ;;  %v543_v56 = vld [vmem:[#allocation7 + $0xa0] sm:$0xff] }
  0x40   :  { %v546_v51 = vld [vmem:[#allocation7 + $0xb8] sm:$0xff]  ;;  %v545_v57 = vld [vmem:[#allocation7 + $0xb0] sm:$0xff]  ;;  %v66_v60 = vld [vmem:[#allocation2 + $0x20] sm:$0xff] }
  0x41   :  { %279 = vmatpush1.bf16.msra.mxu0 %v224_v46  ;;  %v601_v46 = vpack.c.bf16 %v553_v43, %v551_v40  ;;  %663 = vmatprep.subr.bf16.mxu1 %v602_v42  ;;  %v598_v55 = vpack.c.bf16 %v546_v51, %v544_v50  ;;  %v68_v61 = vld [vmem:[#allocation2 + $0x30] sm:$0xff]  ;;  %v597_v62 = vpack.c.bf16 %v545_v57, %v543_v56  ;;  %v71_v63 = vld [vmem:[#allocation2 + $0x48] sm:$0xff]  ;;  %v73_v3 = vld [vmem:[#allocation2 + $0x58] sm:$0xff] }
  0x42   :  { %280 = vmatprep.subr.bf16.mxu0 %v223_v47  ;;  %v600_v47 = vpack.c.bf16 %v550_v45, %v548_v44  ;;  %v541_v2 = vld [vmem:[#allocation7 + $0x90] sm:$0xff]  ;;  %v536_v4 = vld [vmem:[#allocation7 + $0x68] sm:$0xff]  ;;  %v538_v5 = vld [vmem:[#allocation7 + $0x78] sm:$0xff]  ;;  %v131_v8 = vpack.c.bf16 %v73_v3, %v71_v63 }
  0x43   :  { %664 = vmatpush1.bf16.msra.mxu1 %v601_v46  ;;  %v594_v9 = vpack.c.bf16 %v538_v5, %v536_v4  ;;  %v535_v10 = vld [vmem:[#allocation7 + $0x60] sm:$0xff]  ;;  %v537_v11 = vld [vmem:[#allocation7 + $0x70] sm:$0xff]  ;;  %v75_v17 = vld [vmem:[#allocation2 + $0x68] sm:$0xff] }
  0x44   :  { %665 = vmatprep.subr.bf16.mxu1 %v600_v47  ;;  %v70_v14 = vld [vmem:[#allocation2 + $0x40] sm:$0xff]  ;;  %v72_v15 = vld [vmem:[#allocation2 + $0x50] sm:$0xff]  ;;  %v593_v16 = vpack.c.bf16 %v537_v11, %v535_v10  ;;  %v77_v21 = vld [vmem:[#allocation2 + $0x78] sm:$0xff] }
  0x45   :  { %281 = vmatpush1.bf16.msra.mxu0 %v222_v52  ;;  %v126_v52 = vpack.c.bf16 %v64_v35, %v62_v34  ;;  %v533_v20 = vld [vmem:[#allocation7 + $0x50] sm:$0xff]  ;;  %v528_v22 = vld [vmem:[#allocation7 + $0x28] sm:$0xff]  ;;  %v530_v23 = vld [vmem:[#allocation7 + $0x38] sm:$0xff]  ;;  %v133_v26 = vpack.c.bf16 %v77_v21, %v75_v17 }
  0x46   :  { %282 = vmatprep.subr.bf16.mxu0 %v253_v53  ;;  %v599_v53 = vpack.c.bf16 %v549_v49, %v547_v48  ;;  %v590_v27 = vpack.c.bf16 %v530_v23, %v528_v22  ;;  %v527_v28 = vld [vmem:[#allocation7 + $0x20] sm:$0xff]  ;;  %v529_v29 = vld [vmem:[#allocation7 + $0x30] sm:$0xff]  ;;  %v79_v35 = vld [vmem:[#allocation2 + $0x88] sm:$0xff] }
  0x47   :  { %v74_v32 = vld [vmem:[#allocation2 + $0x60] sm:$0xff]  ;;  %v76_v33 = vld [vmem:[#allocation2 + $0x70] sm:$0xff]  ;;  %v589_v34 = vpack.c.bf16 %v529_v29, %v527_v28  ;;  %v81_v39 = vld [vmem:[#allocation2 + $0x98] sm:$0xff] }
  0x48   :  { %666 = vmatpush1.bf16.msra.mxu1 %v599_v53  ;;  %v523_v37 = vld [vmem:[#allocation7] sm:$0xff]  ;;  %v525_v38 = vld [vmem:[#allocation7 + $0x10] sm:$0xff]  ;;  %v584_v40 = vld [vmem:[#allocation7 + $0x1e8] sm:$0xff]  ;;  %v132_v42 = vpack.c.bf16 %v76_v33, %v74_v32  ;;  %v135_v44 = vpack.c.bf16 %v81_v39, %v79_v35 }
  0x49   :  { %283 = vmatpush2.bf16.msra.mxu0 %v252_v58  ;;  %v540_v58 = vld [vmem:[#allocation7 + $0x88] sm:$0xff]  ;;  %667 = vmatprep.subr.bf16.mxu1 %v598_v55  ;;  %v587_v43 = vpack.c.bf16 %v525_v38, %v523_v37  ;;  %v583_v46 = vld [vmem:[#allocation7 + $0x1e0] sm:$0xff]  ;;  %v585_v47 = vld [vmem:[#allocation7 + $0x1f0] sm:$0xff] }
  0x4a   :  { %284 = vmatprep.subr.bf16.mxu0 %v251_v59  ;;  %v542_v59 = vld [vmem:[#allocation7 + $0x98] sm:$0xff]  ;;  %v580_v48 = vld [vmem:[#allocation7 + $0x1c8] sm:$0xff]  ;;  %v78_v50 = vld [vmem:[#allocation2 + $0x80] sm:$0xff] }
  0x4b   :  { %v582_v49 = vld [vmem:[#allocation7 + $0x1d8] sm:$0xff]  ;;  %v80_v51 = vld [vmem:[#allocation2 + $0x90] sm:$0xff]  ;;  %v83_v53 = vld [vmem:[#allocation2 + $0xa8] sm:$0xff] }
  0x4c   :  { %668 = vmatpush1.bf16.msra.mxu1 %v597_v62  ;;  %v579_v55 = vld [vmem:[#allocation7 + $0x1c0] sm:$0xff]  ;;  %v581_v56 = vld [vmem:[#allocation7 + $0x1d0] sm:$0xff]  ;;  %v85_v57 = vld [vmem:[#allocation2 + $0xb8] sm:$0xff] }
  0x4d   :  { %285 = vmatpush2.bf16.msra.mxu0 %v250_v0  ;;  %v596_v0 = vpack.c.bf16 %v542_v59, %v540_v58  ;;  %v576_v58 = vld [vmem:[#allocation7 + $0x1a8] sm:$0xff]  ;;  %v578_v59 = vld [vmem:[#allocation7 + $0x1b8] sm:$0xff]  ;;  %v137_v62 = vpack.c.bf16 %v85_v57, %v83_v53  ;;  %v82_v4 = vld [vmem:[#allocation2 + $0xa0] sm:$0xff] }
  0x4e   :  { %286 = vmatprep.subr.bf16.mxu0 %v249_v1  ;;  %v539_v1 = vld [vmem:[#allocation7 + $0x80] sm:$0xff]  ;;  %v614_v63 = vpack.c.bf16 %v578_v59, %v576_v58  ;;  %v574_v3 = vld [vmem:[#allocation7 + $0x198] sm:$0xff]  ;;  %v84_v5 = vld [vmem:[#allocation2 + $0xb0] sm:$0xff] }
  0x4f   :  { %669 = vmatprep.subr.bf16.mxu1 %v596_v0  ;;  %v575_v0 = vld [vmem:[#allocation7 + $0x1a0] sm:$0xff]  ;;  %v573_v10 = vld [vmem:[#allocation7 + $0x190] sm:$0xff]  ;;  %v89_v11 = vld [vmem:[#allocation2 + $0xd8] sm:$0xff] }
  0x50   :  { %v86_v21 = vld [vmem:[#allocation2 + $0xc0] sm:$0xff]  ;;  %v88_v22 = vld [vmem:[#allocation2 + $0xd0] sm:$0xff]  ;;  %v91_v23 = vld [vmem:[#allocation2 + $0xe8] sm:$0xff] }
  0x51   :  { %287 = vmatpush2.bf16.msra.mxu0 %v248_v6  ;;  %v128_v6 = vpack.c.bf16 %v68_v61, %v66_v60  ;;  %v134_v60 = vpack.c.bf16 %v80_v51, %v78_v50  ;;  %v615_v61 = vpack.c.bf16 %v581_v56, %v579_v55  ;;  %v92_v28 = vld [vmem:[#allocation2 + $0xf0] sm:$0xff]  ;;  %v95_v29 = vld [vmem:[#allocation2 + $0x108] sm:$0xff]  ;;  %v94_v33 = vld [vmem:[#allocation2 + $0x100] sm:$0xff] }
  0x52   :  { %288 = vmatprep.subr.bf16.mxu0 %v247_v7  ;;  %v595_v7 = vpack.c.bf16 %v541_v2, %v539_v1  ;;  %v577_v1 = vld [vmem:[#allocation7 + $0x1b0] sm:$0xff]  ;;  %v572_v2 = vld [vmem:[#allocation7 + $0x188] sm:$0xff]  ;;  %v562_v50 = vld [vmem:[#allocation7 + $0x138] sm:$0xff] }
  0x53   :  { %v99_v35 = vld [vmem:[#allocation2 + $0x128] sm:$0xff]  ;;  %v559_v53 = vld [vmem:[#allocation7 + $0x120] sm:$0xff]  ;;  %v558_v58 = vld [vmem:[#allocation7 + $0x118] sm:$0xff] }
  0x54   :  { %670 = vmatpush1.bf16.msra.mxu1 %v595_v7  ;;  %v87_v7 = vld [vmem:[#allocation2 + $0xc8] sm:$0xff] }
  0x55   :  { %289 = vmatpush2.bf16.msra.mxu0 %v246_v12  ;;  %v532_v12 = vld [vmem:[#allocation7 + $0x48] sm:$0xff]  ;;  %671 = vmatprep.subr.bf16.mxu1 %v594_v9  ;;  %v571_v9 = vld [vmem:[#allocation7 + $0x180] sm:$0xff] }
  0x56   :  { %290 = vmatprep.subr.bf16.mxu0 %v245_v13  ;;  %v534_v13 = vld [vmem:[#allocation7 + $0x58] sm:$0xff]  ;;  %v564_v39 = vld [vmem:[#allocation7 + $0x148] sm:$0xff] }
  0x57   :  { %v556_v57 = vld [vmem:[#allocation7 + $0x108] sm:$0xff] }
  0x58   :  { %672 = vmatpush1.bf16.msra.mxu1 %v593_v16  ;;  %v139_v16 = vpack.c.bf16 %v89_v11, %v87_v7  ;;  %v604_v59 = vpack.c.bf16 %v558_v58, %v556_v57  ;;  %v111_v7 = vld [vmem:[#allocation2 + $0x188] sm:$0xff]  ;;  %v110_v11 = vld [vmem:[#allocation2 + $0x180] sm:$0xff] }
  0x59   :  { %291 = vmatpush2.bf16.msra.mxu0 %v244_v18  ;;  %v592_v18 = vpack.c.bf16 %v534_v13, %v532_v12  ;;  %v568_v12 = vld [vmem:[#allocation7 + $0x168] sm:$0xff]  ;;  %v570_v13 = vld [vmem:[#allocation7 + $0x178] sm:$0xff] }
  0x5a   :  { %292 = vmatprep.subr.bf16.mxu0 %v243_v19  ;;  %v531_v19 = vld [vmem:[#allocation7 + $0x40] sm:$0xff]  ;;  %v610_v17 = vpack.c.bf16 %v570_v13, %v568_v12  ;;  %v112_v12 = vld [vmem:[#allocation2 + $0x190] sm:$0xff]  ;;  %v115_v13 = vld [vmem:[#allocation2 + $0x1a8] sm:$0xff] }
  0x5b   :  { %673 = vmatprep.subr.bf16.mxu1 %v592_v18  ;;  %v567_v18 = vld [vmem:[#allocation7 + $0x160] sm:$0xff] }
  0x5d   :  { %293 = vmatpush2.bf16.msra.mxu0 %v242_v24  ;;  %v130_v24 = vpack.c.bf16 %v72_v15, %v70_v14  ;;  %v136_v14 = vpack.c.bf16 %v84_v5, %v82_v4  ;;  %v611_v15 = vpack.c.bf16 %v573_v10, %v571_v9  ;;  %v106_v5 = vld [vmem:[#allocation2 + $0x160] sm:$0xff] }
  0x5e   :  { %294 = vmatprep.subr.bf16.mxu0 %v241_v25  ;;  %v591_v25 = vpack.c.bf16 %v533_v20, %v531_v19  ;;  %v569_v19 = vld [vmem:[#allocation7 + $0x170] sm:$0xff] }
  0x5f   :  { %v609_v20 = vpack.c.bf16 %v569_v19, %v567_v18  ;;  %v116_v18 = vld [vmem:[#allocation2 + $0x1b0] sm:$0xff]  ;;  %v119_v19 = vld [vmem:[#allocation2 + $0x1c8] sm:$0xff] }
  0x60   :  { %674 = vmatpush1.bf16.msra.mxu1 %v591_v25  ;;  %v138_v25 = vpack.c.bf16 %v88_v22, %v86_v21 }
  0x61   :  { %295 = vmatpush2.bf16.msra.mxu0 %v240_v30  ;;  %v524_v30 = vld [vmem:[#allocation7 + $0x8] sm:$0xff]  ;;  %675 = vmatprep.subr.bf16.mxu1 %v590_v27  ;;  %v90_v27 = vld [vmem:[#allocation2 + $0xe0] sm:$0xff] }
  0x62   :  { %296 = vmatprep.subr.bf16.mxu0 %v239_v31  ;;  %v526_v31 = vld [vmem:[#allocation7 + $0x18] sm:$0xff] }
  0x63   :  { %v588_v36 = vpack.c.bf16 %v526_v31, %v524_v30  ;;  %v97_v30 = vld [vmem:[#allocation2 + $0x118] sm:$0xff]  ;;  %v140_v31 = vpack.c.bf16 %v92_v28, %v90_v27 }
  0x64   :  { %676 = vmatpush1.bf16.msra.mxu1 %v589_v34  ;;  %v143_v32 = vpack.c.bf16 %v97_v30, %v95_v29  ;;  %v96_v34 = vld [vmem:[#allocation2 + $0x110] sm:$0xff]  ;;  %v122_v29 = vld [vmem:[#allocation2 + $0x1e0] sm:$0xff] }
  0x65   :  { %297 = vmatpush2.bf16.msra.mxu0 %v238_v41  ;;  %v586_v41 = vld [vmem:[#allocation7 + $0x1f8] sm:$0xff]  ;;  %677 = vmatprep.subr.bf16.mxu1 %v588_v36  ;;  %v142_v37 = vpack.c.bf16 %v96_v34, %v94_v33  ;;  %v124_v30 = vld [vmem:[#allocation2 + $0x1f0] sm:$0xff] }
  0x66   :  { %v618_v45 = vpack.c.bf16 %v586_v41, %v584_v40  ;;  %v101_v36 = vld [vmem:[#allocation2 + $0x138] sm:$0xff] }
  0x67   :  { %v145_v38 = vpack.c.bf16 %v101_v36, %v99_v35  ;;  %v566_v40 = vld [vmem:[#allocation7 + $0x158] sm:$0xff]  ;;  %v254_v36 = vld [vmem:[%s2166_s2] sm:$0x3] }
  0x68   :  { %299 = vmatmul.mubr.bf16.vlgmr.msra.gmra.mxu0 %v126_v52  ;;  %678 = vmatpush1.bf16.msra.mxu1 %v587_v43  ;;  %v617_v52 = vpack.c.bf16 %v585_v47, %v583_v46  ;;  %v608_v41 = vpack.c.bf16 %v566_v40, %v564_v39  ;;  %v565_v43 = vld [vmem:[#allocation7 + $0x150] sm:$0xff]  ;;  %v103_v47 = vld [vmem:[#allocation2 + $0x148] sm:$0xff] }
  0x69   :  { %308 = vmatprep.mubr.bf16.mxu0 %v129_v54  ;;  %679 = vmatprep.subr.bf16.mxu1 %v618_v45  ;;  %v616_v54 = vpack.c.bf16 %v582_v49, %v580_v48  ;;  %v100_v45 = vld [vmem:[#allocation2 + $0x130] sm:$0xff]  ;;  %v105_v48 = vld [vmem:[#allocation2 + $0x158] sm:$0xff]  ;;  %v560_v49 = vld [vmem:[#allocation7 + $0x128] sm:$0xff] }
  0x6a   :  { %v147_v55 = vpack.c.bf16 %v105_v48, %v103_v47 }
  0x6c   :  { %680 = vmatpush2.bf16.msra.mxu1 %v617_v52  ;;  %v606_v52 = vpack.c.bf16 %v562_v50, %v560_v49 }
  0x6d   :  { %681 = vmatprep.subr.bf16.mxu1 %v616_v54  ;;  %v561_v54 = vld [vmem:[#allocation7 + $0x130] sm:$0xff] }
  0x6e   :  { %v605_v56 = vpack.c.bf16 %v561_v54, %v559_v53 }
  0x70   :  { %309 = vmatmul.mubr.bf16.gmra.mxu0 %v128_v6  ;;  %682 = vmatpush2.bf16.msra.mxu1 %v615_v61  ;;  %v613_v6 = vpack.c.bf16 %v577_v1, %v575_v0  ;;  %v557_v61 = vld [vmem:[#allocation7 + $0x110] sm:$0xff]  ;;  %v107_v1 = vld [vmem:[#allocation2 + $0x168] sm:$0xff] }
  0x71   :  { %318 = vmatprep.mubr.bf16.mxu0 %v131_v8  ;;  %683 = vmatprep.subr.bf16.mxu1 %v614_v63  ;;  %v612_v8 = vpack.c.bf16 %v574_v3, %v572_v2  ;;  %v104_v63 = vld [vmem:[#allocation2 + $0x150] sm:$0xff]  ;;  %v109_v2 = vld [vmem:[#allocation2 + $0x178] sm:$0xff] }
  0x72   :  { %v149_v4 = vpack.c.bf16 %v109_v2, %v107_v1 }
  0x74   :  { %684 = vmatpush2.bf16.msra.mxu1 %v613_v6  ;;  %v108_v6 = vld [vmem:[#allocation2 + $0x170] sm:$0xff] }
  0x75   :  { %685 = vmatprep.subr.bf16.mxu1 %v612_v8  ;;  %v113_v8 = vld [vmem:[#allocation2 + $0x198] sm:$0xff]  ;;  %v148_v9 = vpack.c.bf16 %v108_v6, %v106_v5 }
  0x76   :  { %v151_v10 = vpack.c.bf16 %v113_v8, %v111_v7 }
  0x78   :  { %319 = vmatmul.mubr.bf16.gmra.mxu0 %v130_v24  ;;  %686 = vmatpush2.bf16.msra.mxu1 %v611_v15  ;;  %v93_v24 = vld [vmem:[#allocation2 + $0xf8] sm:$0xff]  ;;  %v150_v15 = vpack.c.bf16 %v112_v12, %v110_v11 }
  0x79   :  { %328 = vmatprep.mubr.bf16.mxu0 %v133_v26  ;;  %687 = vmatprep.subr.bf16.mxu1 %v610_v17  ;;  %v141_v26 = vpack.c.bf16 %v93_v24, %v91_v23  ;;  %v114_v17 = vld [vmem:[#allocation2 + $0x1a0] sm:$0xff]  ;;  %v120_v24 = vld [vmem:[#allocation2 + $0x1d0] sm:$0xff] }
  0x7a   :  { %v152_v21 = vpack.c.bf16 %v116_v18, %v114_v17  ;;  %v118_v23 = vld [vmem:[#allocation2 + $0x1c0] sm:$0xff] }
  0x7b   :  { %v154_v27 = vpack.c.bf16 %v120_v24, %v118_v23 }
  0x7c   :  { %688 = vmatpush2.bf16.msra.mxu1 %v609_v20  ;;  %v121_v20 = vld [vmem:[#allocation2 + $0x1d8] sm:$0xff] }
  0x7d   :  { %689 = vmatprep.subr.bf16.mxu1 %v608_v41  ;;  %v155_v22 = vpack.c.bf16 %v121_v20, %v119_v19 }
  0x80   :  { %329 = vmatmul.mubr.bf16.gmra.mxu0 %v132_v42  ;;  %v563_v42 = vld [vmem:[#allocation7 + $0x140] sm:$0xff] }
  0x81   :  { %338 = vmatprep.mubr.bf16.mxu0 %v135_v44  ;;  %v98_v44 = vld [vmem:[#allocation2 + $0x120] sm:$0xff]  ;;  %v607_v46 = vpack.c.bf16 %v565_v43, %v563_v42 }
  0x82   :  { %v144_v51 = vpack.c.bf16 %v100_v45, %v98_v44 }
  0x83   :  { %690 = vmatpush2.bf16.msra.mxu1 %v607_v46 }
  0x84   :  { %691 = vmatprep.subr.bf16.mxu1 %v606_v52 }
  0x87   :  { %692 = vmatpush2.bf16.msra.mxu1 %v605_v56 }
  0x88   :  { %339 = vmatmul.mubr.bf16.gmra.mxu0 %v134_v60  ;;  %v555_v60 = vld [vmem:[#allocation7 + $0x100] sm:$0xff]  ;;  %693 = vmatprep.subr.bf16.mxu1 %v604_v59 }
  0x89   :  { %348 = vmatprep.mubr.bf16.mxu0 %v137_v62  ;;  %v102_v62 = vld [vmem:[#allocation2 + $0x140] sm:$0xff]  ;;  %v603_v0 = vpack.c.bf16 %v557_v61, %v555_v60 }
  0x8a   :  { %v146_v3 = vpack.c.bf16 %v104_v63, %v102_v62 }
  0x8b   :  { %694 = vmatpush2.bf16.msra.mxu1 %v603_v0 }
  0x90   :  { %349 = vmatmul.mubr.bf16.gmra.mxu0 %v136_v14  ;;  %v117_v14 = vld [vmem:[#allocation2 + $0x1b8] sm:$0xff] }
  0x91   :  { %358 = vmatprep.mubr.bf16.mxu0 %v139_v16  ;;  %v153_v16 = vpack.c.bf16 %v117_v14, %v115_v13 }
  0x98   :  { %359 = vmatmul.mubr.bf16.gmra.mxu0 %v138_v25  ;;  %v123_v25 = vld [vmem:[#allocation2 + $0x1e8] sm:$0xff] }
  0x99   :  { %368 = vmatprep.mubr.bf16.mxu0 %v141_v26  ;;  %v125_v26 = vld [vmem:[#allocation2 + $0x1f8] sm:$0xff] }
  0x9a   :  { %v157_v28 = vpack.c.bf16 %v125_v26, %v123_v25 }
  0xa0   :  { %369 = vmatmul.mubr.bf16.gmra.mxu0 %v140_v31  ;;  %v156_v31 = vpack.c.bf16 %v124_v30, %v122_v29 }
  0xa1   :  { %378 = vmatprep.mubr.bf16.mxu0 %v143_v32  ;;  %v256_v32 = vlaneseq }
  0xa3   :  { %v2007_v33 = vshrl.u32 %v256_v32, 7 }
  0xa5   :  { %v262_v34 = vsub.s32 1, %v2007_v33  ;;  %v258_v35 = vsub.s32 0, %v2007_v33 }
  0xa7   :  { %v2020_v39 = vrot.slane %v254_v36, %v258_v35 }
  0xa8   :  { %379 = vmatmul.mubr.bf16.gmra.mxu0 %v142_v37 }
  0xa9   :  { %388 = vmatprep.mubr.bf16.mxu0 %v145_v38  ;;  %v2016_v38 = vrot.slane %v254_v36, %v262_v34 }
  0xb0   :  { %389 = vmatmul.mubr.bf16.gmra.mxu0 %v144_v51 }
  0xb1   :  { %398 = vmatprep.mubr.bf16.mxu0 %v147_v55 }
  0xb8   :  { %399 = vmatmul.mubr.bf16.gmra.mxu0 %v146_v3 }
  0xb9   :  { %408 = vmatprep.mubr.bf16.mxu0 %v149_v4 }
  0xc0   :  { %409 = vmatmul.mubr.bf16.gmra.mxu0 %v148_v9 }
  0xc1   :  { %418 = vmatprep.mubr.bf16.mxu0 %v151_v10 }
  0xc8   :  { %419 = vmatmul.mubr.bf16.gmra.mxu0 %v150_v15 }
  0xc9   :  { %428 = vmatprep.mubr.bf16.mxu0 %v153_v16 }
  0xd0   :  { %429 = vmatmul.mubr.bf16.gmra.mxu0 %v152_v21 }
  0xd1   :  { %438 = vmatprep.mubr.bf16.mxu0 %v155_v22 }
  0xd8   :  { %439 = vmatmul.mubr.bf16.gmra.mxu0 %v154_v27 }
  0xd9   :  { %448 = vmatprep.mubr.bf16.mxu0 %v157_v28 }
  0xe0   :  { %449 = vmatmul.mubr.bf16.gmra.mxu0 %v156_v31 }
 0x128   :  { %v300_v37 = vpop.f32.mrf.mxu0 }
 0x129   :  { %v301_v44 = vadd.f32 %v300_v37, %v2020_v39 }
 0x12a   :  { %v302_v40 = vpop.f32.mrf.mxu0 }
 0x12b   :  { %v303_v42 = vadd.f32 %v302_v40, %v2016_v38  ;;  %v459_v51 = vmax.f32 %v301_v44, 0.0 }
 0x12c   :  { %v304_v41 = vpop.f32.mrf.mxu0 }
 0x12d   :  { %v305_v43 = vadd.f32 %v304_v41, %v2020_v39  ;;  %v460_v49 = vmax.f32 %v303_v42, 0.0 }
 0x12e   :  { %v306_v45 = vpop.f32.mrf.mxu0 }
 0x12f   :  { %v307_v46 = vadd.f32 %v306_v45, %v2016_v38  ;;  %v461_v47 = vmax.f32 %v305_v43, 0.0 }
 0x130   :  { %v310_v48 = vpop.f32.mrf.mxu0 }
 0x131   :  { %v462_v50 = vmax.f32 %v307_v46, 0.0  ;;  %v619_v54 = vpack.c.bf16 %v461_v47, %v459_v51  ;;  %v311_v58 = vadd.f32 %v310_v48, %v2020_v39 }
 0x132   :  { %v312_v52 = vpop.f32.mrf.mxu0 }
 0x133   :  { %v620_v53 = vpack.c.bf16 %v462_v50, %v460_v49  ;;  %v313_v56 = vadd.f32 %v312_v52, %v2016_v38  ;;  %v463_v1 = vmax.f32 %v311_v58, 0.0 }
 0x134   :  { %v314_v55 = vpop.f32.mrf.mxu0 }
 0x135   :  { %v315_v57 = vadd.f32 %v314_v55, %v2020_v39  ;;  %695 = vmatprep.mubr.bf16.mxu1 %v620_v53  ;;  %v464_v63 = vmax.f32 %v313_v56, 0.0 }
 0x136   :  { %v316_v59 = vpop.f32.mrf.mxu0  ;;  %696 = vmatmul.mubr.bf16.vlgmr.msra.gmra.mxu1 %v619_v54 }
 0x137   :  { %v317_v60 = vadd.f32 %v316_v59, %v2016_v38  ;;  %v465_v61 = vmax.f32 %v315_v57, 0.0 }
 0x138   :  { %v320_v62 = vpop.f32.mrf.mxu0 }
 0x139   :  { %v466_v0 = vmax.f32 %v317_v60, 0.0  ;;  %v621_v4 = vpack.c.bf16 %v465_v61, %v463_v1  ;;  %v321_v8 = vadd.f32 %v320_v62, %v2020_v39 }
 0x13a   :  { %v322_v2 = vpop.f32.mrf.mxu0 }
 0x13b   :  { %v622_v3 = vpack.c.bf16 %v466_v0, %v464_v63  ;;  %v323_v6 = vadd.f32 %v322_v2, %v2016_v38  ;;  %v467_v15 = vmax.f32 %v321_v8, 0.0 }
 0x13c   :  { %v324_v5 = vpop.f32.mrf.mxu0 }
 0x13d   :  { %v325_v7 = vadd.f32 %v324_v5, %v2020_v39  ;;  %705 = vmatprep.mubr.bf16.mxu1 %v622_v3  ;;  %v468_v13 = vmax.f32 %v323_v6, 0.0 }
 0x13e   :  { %v326_v9 = vpop.f32.mrf.mxu0  ;;  %706 = vmatmul.mubr.bf16.gmra.mxu1 %v621_v4 }
 0x13f   :  { %v327_v10 = vadd.f32 %v326_v9, %v2016_v38  ;;  %v469_v11 = vmax.f32 %v325_v7, 0.0 }
 0x140   :  { %v330_v12 = vpop.f32.mrf.mxu0 }
 0x141   :  { %v470_v14 = vmax.f32 %v327_v10, 0.0  ;;  %v623_v18 = vpack.c.bf16 %v469_v11, %v467_v15  ;;  %v331_v22 = vadd.f32 %v330_v12, %v2020_v39 }
 0x142   :  { %v332_v16 = vpop.f32.mrf.mxu0 }
 0x143   :  { %v624_v17 = vpack.c.bf16 %v470_v14, %v468_v13  ;;  %v333_v20 = vadd.f32 %v332_v16, %v2016_v38  ;;  %v471_v29 = vmax.f32 %v331_v22, 0.0 }
 0x144   :  { %v334_v19 = vpop.f32.mrf.mxu0 }
 0x145   :  { %v335_v21 = vadd.f32 %v334_v19, %v2020_v39  ;;  %715 = vmatprep.mubr.bf16.mxu1 %v624_v17  ;;  %v472_v27 = vmax.f32 %v333_v20, 0.0 }
 0x146   :  { %v336_v23 = vpop.f32.mrf.mxu0  ;;  %716 = vmatmul.mubr.bf16.gmra.mxu1 %v623_v18 }
 0x147   :  { %v337_v24 = vadd.f32 %v336_v23, %v2016_v38  ;;  %v473_v25 = vmax.f32 %v335_v21, 0.0 }
 0x148   :  { %v340_v26 = vpop.f32.mrf.mxu0 }
 0x149   :  { %v474_v28 = vmax.f32 %v337_v24, 0.0  ;;  %v625_v32 = vpack.c.bf16 %v473_v25, %v471_v29  ;;  %v341_v41 = vadd.f32 %v340_v26, %v2020_v39 }
 0x14a   :  { %v342_v30 = vpop.f32.mrf.mxu0 }
 0x14b   :  { %v626_v31 = vpack.c.bf16 %v474_v28, %v472_v27  ;;  %v343_v37 = vadd.f32 %v342_v30, %v2016_v38  ;;  %v475_v48 = vmax.f32 %v341_v41, 0.0 }
 0x14c   :  { %v344_v36 = vpop.f32.mrf.mxu0 }
 0x14d   :  { %v345_v40 = vadd.f32 %v344_v36, %v2020_v39  ;;  %725 = vmatprep.mubr.bf16.mxu1 %v626_v31  ;;  %v476_v46 = vmax.f32 %v343_v37, 0.0 }
 0x14e   :  { %v346_v42 = vpop.f32.mrf.mxu0  ;;  %726 = vmatmul.mubr.bf16.gmra.mxu1 %v625_v32 }
 0x14f   :  { %v347_v43 = vadd.f32 %v346_v42, %v2016_v38  ;;  %v477_v44 = vmax.f32 %v345_v40, 0.0 }
 0x150   :  { %v350_v45 = vpop.f32.mrf.mxu0 }
 0x151   :  { %v478_v47 = vmax.f32 %v347_v43, 0.0  ;;  %v627_v51 = vpack.c.bf16 %v477_v44, %v475_v48  ;;  %v351_v55 = vadd.f32 %v350_v45, %v2020_v39 }
 0x152   :  { %v352_v49 = vpop.f32.mrf.mxu0 }
 0x153   :  { %v628_v50 = vpack.c.bf16 %v478_v47, %v476_v46  ;;  %v353_v53 = vadd.f32 %v352_v49, %v2016_v38  ;;  %v479_v62 = vmax.f32 %v351_v55, 0.0 }
 0x154   :  { %v354_v52 = vpop.f32.mrf.mxu0 }
 0x155   :  { %v355_v54 = vadd.f32 %v354_v52, %v2020_v39  ;;  %735 = vmatprep.mubr.bf16.mxu1 %v628_v50  ;;  %v480_v60 = vmax.f32 %v353_v53, 0.0 }
 0x156   :  { %v356_v56 = vpop.f32.mrf.mxu0  ;;  %736 = vmatmul.mubr.bf16.gmra.mxu1 %v627_v51 }
 0x157   :  { %v357_v57 = vadd.f32 %v356_v56, %v2016_v38  ;;  %v481_v58 = vmax.f32 %v355_v54, 0.0 }
 0x158   :  { %v360_v59 = vpop.f32.mrf.mxu0 }
 0x159   :  { %v482_v61 = vmax.f32 %v357_v57, 0.0  ;;  %v629_v1 = vpack.c.bf16 %v481_v58, %v479_v62  ;;  %v361_v5 = vadd.f32 %v360_v59, %v2020_v39 }
 0x15a   :  { %v362_v63 = vpop.f32.mrf.mxu0 }
 0x15b   :  { %v630_v0 = vpack.c.bf16 %v482_v61, %v480_v60  ;;  %v363_v3 = vadd.f32 %v362_v63, %v2016_v38  ;;  %v483_v12 = vmax.f32 %v361_v5, 0.0 }
 0x15c   :  { %v364_v2 = vpop.f32.mrf.mxu0 }
 0x15d   :  { %v365_v4 = vadd.f32 %v364_v2, %v2020_v39  ;;  %745 = vmatprep.mubr.bf16.mxu1 %v630_v0  ;;  %v484_v10 = vmax.f32 %v363_v3, 0.0 }
 0x15e   :  { %v366_v6 = vpop.f32.mrf.mxu0  ;;  %746 = vmatmul.mubr.bf16.gmra.mxu1 %v629_v1 }
 0x15f   :  { %v367_v7 = vadd.f32 %v366_v6, %v2016_v38  ;;  %v485_v8 = vmax.f32 %v365_v4, 0.0 }
 0x160   :  { %v370_v9 = vpop.f32.mrf.mxu0 }
 0x161   :  { %v486_v11 = vmax.f32 %v367_v7, 0.0  ;;  %v631_v15 = vpack.c.bf16 %v485_v8, %v483_v12  ;;  %v371_v19 = vadd.f32 %v370_v9, %v2020_v39 }
 0x162   :  { %v372_v13 = vpop.f32.mrf.mxu0 }
 0x163   :  { %v632_v14 = vpack.c.bf16 %v486_v11, %v484_v10  ;;  %v373_v17 = vadd.f32 %v372_v13, %v2016_v38  ;;  %v487_v26 = vmax.f32 %v371_v19, 0.0 }
 0x164   :  { %v374_v16 = vpop.f32.mrf.mxu0 }
 0x165   :  { %v375_v18 = vadd.f32 %v374_v16, %v2020_v39  ;;  %755 = vmatprep.mubr.bf16.mxu1 %v632_v14  ;;  %v488_v24 = vmax.f32 %v373_v17, 0.0 }
 0x166   :  { %v376_v20 = vpop.f32.mrf.mxu0  ;;  %756 = vmatmul.mubr.bf16.gmra.mxu1 %v631_v15 }
 0x167   :  { %v377_v21 = vadd.f32 %v376_v20, %v2016_v38  ;;  %v489_v22 = vmax.f32 %v375_v18, 0.0 }
 0x168   :  { %v380_v23 = vpop.f32.mrf.mxu0 }
 0x169   :  { %v490_v25 = vmax.f32 %v377_v21, 0.0  ;;  %v633_v29 = vpack.c.bf16 %v489_v22, %v487_v26  ;;  %v381_v36 = vadd.f32 %v380_v23, %v2020_v39 }
 0x16a   :  { %v382_v27 = vpop.f32.mrf.mxu0 }
 0x16b   :  { %v634_v28 = vpack.c.bf16 %v490_v25, %v488_v24  ;;  %v383_v31 = vadd.f32 %v382_v27, %v2016_v38  ;;  %v491_v45 = vmax.f32 %v381_v36, 0.0 }
 0x16c   :  { %v384_v30 = vpop.f32.mrf.mxu0 }
 0x16d   :  { %v385_v32 = vadd.f32 %v384_v30, %v2020_v39  ;;  %765 = vmatprep.mubr.bf16.mxu1 %v634_v28  ;;  %v492_v43 = vmax.f32 %v383_v31, 0.0 }
 0x16e   :  { %v386_v37 = vpop.f32.mrf.mxu0  ;;  %766 = vmatmul.mubr.bf16.gmra.mxu1 %v633_v29 }
 0x16f   :  { %v387_v40 = vadd.f32 %v386_v37, %v2016_v38  ;;  %v493_v41 = vmax.f32 %v385_v32, 0.0 }
 0x170   :  { %v390_v42 = vpop.f32.mrf.mxu0 }
 0x171   :  { %v494_v44 = vmax.f32 %v387_v40, 0.0  ;;  %v635_v48 = vpack.c.bf16 %v493_v41, %v491_v45  ;;  %v391_v52 = vadd.f32 %v390_v42, %v2020_v39 }
 0x172   :  { %v392_v46 = vpop.f32.mrf.mxu0 }
 0x173   :  { %v636_v47 = vpack.c.bf16 %v494_v44, %v492_v43  ;;  %v393_v50 = vadd.f32 %v392_v46, %v2016_v38  ;;  %v495_v59 = vmax.f32 %v391_v52, 0.0 }
 0x174   :  { %v394_v49 = vpop.f32.mrf.mxu0 }
 0x175   :  { %v395_v51 = vadd.f32 %v394_v49, %v2020_v39  ;;  %775 = vmatprep.mubr.bf16.mxu1 %v636_v47  ;;  %v496_v57 = vmax.f32 %v393_v50, 0.0 }
 0x176   :  { %v396_v53 = vpop.f32.mrf.mxu0  ;;  %776 = vmatmul.mubr.bf16.gmra.mxu1 %v635_v48 }
 0x177   :  { %v397_v54 = vadd.f32 %v396_v53, %v2016_v38  ;;  %v497_v55 = vmax.f32 %v395_v51, 0.0 }
 0x178   :  { %v400_v56 = vpop.f32.mrf.mxu0 }
 0x179   :  { %v498_v58 = vmax.f32 %v397_v54, 0.0  ;;  %v637_v62 = vpack.c.bf16 %v497_v55, %v495_v59  ;;  %v401_v2 = vadd.f32 %v400_v56, %v2020_v39 }
 0x17a   :  { %v402_v60 = vpop.f32.mrf.mxu0 }
 0x17b   :  { %v638_v61 = vpack.c.bf16 %v498_v58, %v496_v57  ;;  %v403_v0 = vadd.f32 %v402_v60, %v2016_v38  ;;  %v499_v9 = vmax.f32 %v401_v2, 0.0 }
 0x17c   :  { %v404_v63 = vpop.f32.mrf.mxu0 }
 0x17d   :  { %v405_v1 = vadd.f32 %v404_v63, %v2020_v39  ;;  %785 = vmatprep.mubr.bf16.mxu1 %v638_v61  ;;  %v500_v7 = vmax.f32 %v403_v0, 0.0 }
 0x17e   :  { %v406_v3 = vpop.f32.mrf.mxu0  ;;  %786 = vmatmul.mubr.bf16.gmra.mxu1 %v637_v62 }
 0x17f   :  { %v407_v4 = vadd.f32 %v406_v3, %v2016_v38  ;;  %v501_v5 = vmax.f32 %v405_v1, 0.0 }
 0x180   :  { %v410_v6 = vpop.f32.mrf.mxu0 }
 0x181   :  { %v502_v8 = vmax.f32 %v407_v4, 0.0  ;;  %v639_v12 = vpack.c.bf16 %v501_v5, %v499_v9  ;;  %v411_v16 = vadd.f32 %v410_v6, %v2020_v39 }
 0x182   :  { %v412_v10 = vpop.f32.mrf.mxu0 }
 0x183   :  { %v640_v11 = vpack.c.bf16 %v502_v8, %v500_v7  ;;  %v413_v14 = vadd.f32 %v412_v10, %v2016_v38  ;;  %v503_v23 = vmax.f32 %v411_v16, 0.0 }
 0x184   :  { %v414_v13 = vpop.f32.mrf.mxu0 }
 0x185   :  { %v415_v15 = vadd.f32 %v414_v13, %v2020_v39  ;;  %795 = vmatprep.mubr.bf16.mxu1 %v640_v11  ;;  %v504_v21 = vmax.f32 %v413_v14, 0.0 }
 0x186   :  { %v416_v17 = vpop.f32.mrf.mxu0  ;;  %796 = vmatmul.mubr.bf16.gmra.mxu1 %v639_v12 }
 0x187   :  { %v417_v18 = vadd.f32 %v416_v17, %v2016_v38  ;;  %v505_v19 = vmax.f32 %v415_v15, 0.0 }
 0x188   :  { %v420_v20 = vpop.f32.mrf.mxu0 }
 0x189   :  { %v506_v22 = vmax.f32 %v417_v18, 0.0  ;;  %v641_v26 = vpack.c.bf16 %v505_v19, %v503_v23  ;;  %v421_v30 = vadd.f32 %v420_v20, %v2020_v39 }
 0x18a   :  { %v422_v24 = vpop.f32.mrf.mxu0 }
 0x18b   :  { %v642_v25 = vpack.c.bf16 %v506_v22, %v504_v21  ;;  %v423_v28 = vadd.f32 %v422_v24, %v2016_v38  ;;  %v507_v42 = vmax.f32 %v421_v30, 0.0  ;;  %v651_v22 = vld [vmem:[%s2168_s4] sm:$0x3]  ;;  %s1965_s4 = smov [#allocation8]  }
 0x18c   :  { %v424_v27 = vpop.f32.mrf.mxu0  ;;  %v2091_v23 = vrot.slane %v651_v22, %v258_v35  ;;  %s1469_s10 = sshll.u32 %s1965_s4, 4  ;;  %s1470_s10 = int_to_ptr.vmem [resolvable:$true] %s1469_s10 }
 0x18d   :  { %v425_v29 = vadd.f32 %v424_v27, %v2020_v39  ;;  %805 = vmatprep.mubr.bf16.mxu1 %v642_v25  ;;  %v508_v40 = vmax.f32 %v423_v28, 0.0  ;;  %s1934_s11 = scalar_lea.vmem %s1470_s10, 4096  ;;  %p1939_p2 = scmp.lt.s32.totalorder %s1470_s10, %s1470_s10 }
 0x18e   :  { %v426_v31 = vpop.f32.mrf.mxu0  ;;  %806 = vmatmul.mubr.bf16.gmra.mxu1 %v641_v26  ;;  %p1935_p1 = scmp.ne.s32.totalorder %s1470_s10, %s1934_s11  ;;  %p1940_p3 = scmp.lt.s32.totalorder %s1934_s11, %s1934_s11 }
 0x18f   :  { %v427_v32 = vadd.f32 %v426_v31, %v2016_v38  ;;  %v509_v36 = vmax.f32 %v425_v29, 0.0 }
 0x190   :  { %v430_v37 = vpop.f32.mrf.mxu0  ;;  %p1941_p4 = por %p1940_p3, %p1939_p2 }
 0x191   :  { %v510_v41 = vmax.f32 %v427_v32, 0.0  ;;  %v643_v45 = vpack.c.bf16 %v509_v36, %v507_v42  ;;  %v431_v49 = vadd.f32 %v430_v37, %v2020_v39 }
 0x192   :  { %v432_v43 = vpop.f32.mrf.mxu0  ;;  %p1942_p5 = pnand %p1941_p4, %p1935_p1 }
 0x193   :  { %v644_v44 = vpack.c.bf16 %v510_v41, %v508_v40  ;;  %v433_v47 = vadd.f32 %v432_v43, %v2016_v38  ;;  %v511_v56 = vmax.f32 %v431_v49, 0.0 }
 0x194   :  { %v434_v46 = vpop.f32.mrf.mxu0 }
 0x195   :  { %v435_v48 = vadd.f32 %v434_v46, %v2020_v39  ;;  %815 = vmatprep.mubr.bf16.mxu1 %v644_v44  ;;  %v512_v54 = vmax.f32 %v433_v47, 0.0 }
 0x196   :  { %v436_v50 = vpop.f32.mrf.mxu0  ;;  %816 = vmatmul.mubr.bf16.gmra.mxu1 %v643_v45 }
 0x197   :  { %v437_v51 = vadd.f32 %v436_v50, %v2016_v38  ;;  %v513_v52 = vmax.f32 %v435_v48, 0.0 }
 0x198   :  { %v440_v53 = vpop.f32.mrf.mxu0 }
 0x199   :  { %v514_v55 = vmax.f32 %v437_v51, 0.0  ;;  %v645_v59 = vpack.c.bf16 %v513_v52, %v511_v56  ;;  %v441_v63 = vadd.f32 %v440_v53, %v2020_v39 }
 0x19a   :  { %v442_v57 = vpop.f32.mrf.mxu0 }
 0x19b   :  { %v646_v58 = vpack.c.bf16 %v514_v55, %v512_v54  ;;  %v443_v61 = vadd.f32 %v442_v57, %v2016_v38  ;;  %v515_v6 = vmax.f32 %v441_v63, 0.0 }
 0x19c   :  { %v444_v60 = vpop.f32.mrf.mxu0 }
 0x19d   :  { %v445_v62 = vadd.f32 %v444_v60, %v2020_v39  ;;  %825 = vmatprep.mubr.bf16.mxu1 %v646_v58  ;;  %v516_v4 = vmax.f32 %v443_v61, 0.0 }
 0x19e   :  { %v446_v0 = vpop.f32.mrf.mxu0  ;;  %826 = vmatmul.mubr.bf16.gmra.mxu1 %v645_v59 }
 0x19f   :  { %v447_v1 = vadd.f32 %v446_v0, %v2016_v38  ;;  %v517_v2 = vmax.f32 %v445_v62, 0.0 }
 0x1a0   :  { %v450_v3 = vpop.f32.mrf.mxu0 }
 0x1a1   :  { %v518_v5 = vmax.f32 %v447_v1, 0.0  ;;  %v647_v9 = vpack.c.bf16 %v517_v2, %v515_v6  ;;  %v451_v13 = vadd.f32 %v450_v3, %v2020_v39 }
 0x1a2   :  { %v452_v7 = vpop.f32.mrf.mxu0 }
 0x1a3   :  { %v648_v8 = vpack.c.bf16 %v518_v5, %v516_v4  ;;  %v453_v11 = vadd.f32 %v452_v7, %v2016_v38  ;;  %v519_v19 = vmax.f32 %v451_v13, 0.0 }
 0x1a4   :  { %v454_v10 = vpop.f32.mrf.mxu0 }
 0x1a5   :  { %v455_v12 = vadd.f32 %v454_v10, %v2020_v39  ;;  %835 = vmatprep.mubr.bf16.mxu1 %v648_v8  ;;  %v520_v17 = vmax.f32 %v453_v11, 0.0  ;;  %v2095_v39 = vrot.slane %v651_v22, %v262_v34 }
 0x1a6   :  { %v456_v14 = vpop.f32.mrf.mxu0  ;;  %836 = vmatmul.mubr.bf16.gmra.mxu1 %v647_v9 }
 0x1a7   :  { %v457_v15 = vadd.f32 %v456_v14, %v2016_v38  ;;  %v521_v16 = vmax.f32 %v455_v12, 0.0 }
 0x1a9   :  { %v522_v18 = vmax.f32 %v457_v15, 0.0  ;;  %v649_v21 = vpack.c.bf16 %v521_v16, %v519_v19 }
 0x1ab   :  { %v650_v20 = vpack.c.bf16 %v522_v18, %v520_v17 }
 0x1ad   :  { %845 = vmatprep.mubr.bf16.mxu1 %v650_v20 }
 0x1ae   :  { %846 = vmatmul.mubr.bf16.gmra.mxu1 %v649_v21 }
 0x1f6   :  { %v697_v38 = vpop.f32.mrf.mxu1 }
 0x1f7   :  { %v698_v24 = vadd.f32 %v697_v38, %v2091_v23 }
 0x1f8   :  { %v699_v25 = vpop.f32.mrf.mxu1 }
 0x1f9   :  { %v1482_v26 = vmul.f32 -1.442695, %v698_v24  ;;  %v700_v27 = vadd.f32 %v699_v25, %v2095_v39 }
 0x1fa   :  { %v701_v28 = vpop.f32.mrf.mxu1 }
 0x1fb   :  { %1618 = vpow2.f32 %v1482_v26  ;;  %v1483_v29 = vmul.f32 -1.442695, %v700_v27  ;;  %v702_v30 = vadd.f32 %v701_v28, %v2091_v23 }
 0x1fc   :  { %v703_v31 = vpop.f32.mrf.mxu1 }
 0x1fd   :  { %1620 = vpow2.f32 %v1483_v29  ;;  %v1484_v35 = vmul.f32 -1.442695, %v702_v30  ;;  %v704_v32 = vadd.f32 %v703_v31, %v2095_v39 }
 0x1fe   :  { %v707_v33 = vpop.f32.mrf.mxu1 }
 0x1ff   :  { %1622 = vpow2.f32 %v1484_v35  ;;  %v1485_v34 = vmul.f32 -1.442695, %v704_v32  ;;  %v708_v36 = vadd.f32 %v707_v33, %v2091_v23 }
 0x200   :  { %v709_v37 = vpop.f32.mrf.mxu1 }
 0x201   :  { %1624 = vpow2.f32 %v1485_v34  ;;  %v1486_v40 = vmul.f32 -1.442695, %v708_v36  ;;  %v710_v41 = vadd.f32 %v709_v37, %v2095_v39 }
 0x202   :  { %v711_v42 = vpop.f32.mrf.mxu1 }
 0x203   :  { %1626 = vpow2.f32 %v1486_v40  ;;  %v1487_v43 = vmul.f32 -1.442695, %v710_v41  ;;  %v712_v44 = vadd.f32 %v711_v42, %v2091_v23 }
 0x204   :  { %v713_v45 = vpop.f32.mrf.mxu1 }
 0x205   :  { %1628 = vpow2.f32 %v1487_v43  ;;  %v1488_v46 = vmul.f32 -1.442695, %v712_v44  ;;  %v714_v47 = vadd.f32 %v713_v45, %v2095_v39 }
 0x206   :  { %v717_v48 = vpop.f32.mrf.mxu1 }
 0x207   :  { %1630 = vpow2.f32 %v1488_v46  ;;  %v1489_v49 = vmul.f32 -1.442695, %v714_v47  ;;  %v718_v50 = vadd.f32 %v717_v48, %v2091_v23 }
 0x208   :  { %v1619_v51 = vpop.eup %1618  ;;  %v719_v52 = vpop.f32.mrf.mxu1 }
 0x209   :  { %v1048_v53 = vadd.f32 1.0, %v1619_v51  ;;  %1632 = vpow2.f32 %v1489_v49  ;;  %v1490_v54 = vmul.f32 -1.442695, %v718_v50  ;;  %v720_v55 = vadd.f32 %v719_v52, %v2095_v39 }
 0x20a   :  { %v1621_v56 = vpop.eup %1620  ;;  %v721_v57 = vpop.f32.mrf.mxu1 }
 0x20b   :  { %1634 = vrcp.f32 %v1048_v53  ;;  %v1049_v58 = vadd.f32 1.0, %v1621_v56  ;;  %v1491_v59 = vmul.f32 -1.442695, %v720_v55  ;;  %v722_v60 = vadd.f32 %v721_v57, %v2091_v23 }
 0x20c   :  { %v1623_v61 = vpop.eup %1622  ;;  %1636 = vpow2.f32 %v1490_v54  ;;  %v723_v62 = vpop.f32.mrf.mxu1 }
 0x20d   :  { %1638 = vrcp.f32 %v1049_v58  ;;  %v1050_v63 = vadd.f32 1.0, %v1623_v61  ;;  %v1492_v0 = vmul.f32 -1.442695, %v722_v60  ;;  %v724_v1 = vadd.f32 %v723_v62, %v2095_v39 }
 0x20e   :  { %v1625_v2 = vpop.eup %1624  ;;  %1640 = vpow2.f32 %v1491_v59  ;;  %v727_v3 = vpop.f32.mrf.mxu1 }
 0x20f   :  { %1642 = vrcp.f32 %v1050_v63  ;;  %v1051_v4 = vadd.f32 1.0, %v1625_v2  ;;  %v1493_v5 = vmul.f32 -1.442695, %v724_v1  ;;  %v728_v6 = vadd.f32 %v727_v3, %v2091_v23 }
 0x210   :  { %v1627_v7 = vpop.eup %1626  ;;  %1644 = vpow2.f32 %v1492_v0  ;;  %v729_v8 = vpop.f32.mrf.mxu1 }
 0x211   :  { %1646 = vrcp.f32 %v1051_v4  ;;  %v1052_v9 = vadd.f32 1.0, %v1627_v7  ;;  %v1494_v10 = vmul.f32 -1.442695, %v728_v6  ;;  %v730_v11 = vadd.f32 %v729_v8, %v2095_v39 }
 0x212   :  { %v1629_v12 = vpop.eup %1628  ;;  %1648 = vpow2.f32 %v1493_v5  ;;  %v731_v13 = vpop.f32.mrf.mxu1 }
 0x213   :  { %1650 = vrcp.f32 %v1052_v9  ;;  %v1053_v14 = vadd.f32 1.0, %v1629_v12  ;;  %v1495_v15 = vmul.f32 -1.442695, %v730_v11  ;;  %v732_v16 = vadd.f32 %v731_v13, %v2091_v23 }
 0x214   :  { %v1631_v17 = vpop.eup %1630  ;;  %1652 = vpow2.f32 %v1494_v10  ;;  %v733_v18 = vpop.f32.mrf.mxu1 }
 0x215   :  { %1654 = vrcp.f32 %v1053_v14  ;;  %v1054_v19 = vadd.f32 1.0, %v1631_v17  ;;  %v1496_v20 = vmul.f32 -1.442695, %v732_v16  ;;  %v734_v21 = vadd.f32 %v733_v18, %v2095_v39 }
 0x216   :  { %v1633_v22 = vpop.eup %1632  ;;  %1656 = vpow2.f32 %v1495_v15  ;;  %v737_v38 = vpop.f32.mrf.mxu1 }
 0x217   :  { %1658 = vrcp.f32 %v1054_v19  ;;  %v1055_v24 = vadd.f32 1.0, %v1633_v22  ;;  %v1497_v25 = vmul.f32 -1.442695, %v734_v21  ;;  %v738_v26 = vadd.f32 %v737_v38, %v2091_v23 }
 0x218   :  { %v1635_v27 = vpop.eup %1634  ;;  %1660 = vpow2.f32 %v1496_v20  ;;  %v739_v28 = vpop.f32.mrf.mxu1 }
 0x219   :  { %v1637_v29 = vpop.eup %1636  ;;  %1662 = vrcp.f32 %v1055_v24  ;;  %v1498_v30 = vmul.f32 -1.442695, %v738_v26  ;;  %v740_v31 = vadd.f32 %v739_v28, %v2095_v39 }
 0x21a   :  { %v1639_v35 = vpop.eup %1638  ;;  %v1056_v32 = vadd.f32 1.0, %v1637_v29  ;;  %1664 = vpow2.f32 %v1497_v25  ;;  %v741_v33 = vpop.f32.mrf.mxu1 }
 0x21b   :  { %v1641_v34 = vpop.eup %1640  ;;  %v1578_v36 = vpack.c.bf16 %v1639_v35, %v1635_v27  ;;  %1666 = vpow2.f32 %v1498_v30  ;;  %v1499_v37 = vmul.f32 -1.442695, %v740_v31  ;;  %v742_v40 = vadd.f32 %v741_v33, %v2091_v23 }
 0x21c   :  { %v1643_v41 = vpop.eup %1642  ;;  %1668 = vrcp.f32 %v1056_v32  ;;  %v1057_v42 = vadd.f32 1.0, %v1641_v34  ;;  %v743_v43 = vpop.f32.mrf.mxu1 }
 0x21d   :  { %v1645_v44 = vpop.eup %1644  ;;  %1432 = vst [vmem:[#allocation8] sm:$0xff] %v1578_v36  ;;  %1670 = vpow2.f32 %v1499_v37  ;;  %v1500_v45 = vmul.f32 -1.442695, %v742_v40  ;;  %v744_v46 = vadd.f32 %v743_v43, %v2095_v39 }
 0x21e   :  { %v1647_v47 = vpop.eup %1646  ;;  %1672 = vrcp.f32 %v1057_v42  ;;  %v1058_v48 = vadd.f32 1.0, %v1645_v44  ;;  %v747_v49 = vpop.f32.mrf.mxu1 }
 0x21f   :  { %v1649_v50 = vpop.eup %1648  ;;  %v1579_v51 = vpack.c.bf16 %v1647_v47, %v1643_v41  ;;  %1674 = vpow2.f32 %v1500_v45  ;;  %v1501_v52 = vmul.f32 -1.442695, %v744_v46  ;;  %v748_v53 = vadd.f32 %v747_v49, %v2091_v23 }
 0x220   :  { %v1651_v54 = vpop.eup %1650  ;;  %1676 = vrcp.f32 %v1058_v48  ;;  %v1059_v55 = vadd.f32 1.0, %v1649_v50  ;;  %v749_v56 = vpop.f32.mrf.mxu1 }
 0x221   :  { %v1653_v57 = vpop.eup %1652  ;;  %1433 = vst [vmem:[#allocation8 + $0x8] sm:$0xff] %v1579_v51  ;;  %1678 = vpow2.f32 %v1501_v52  ;;  %v1502_v58 = vmul.f32 -1.442695, %v748_v53  ;;  %v750_v59 = vadd.f32 %v749_v56, %v2095_v39 }
 0x222   :  { %v1655_v60 = vpop.eup %1654  ;;  %1680 = vrcp.f32 %v1059_v55  ;;  %v1060_v61 = vadd.f32 1.0, %v1653_v57  ;;  %v751_v62 = vpop.f32.mrf.mxu1 }
 0x223   :  { %v1657_v63 = vpop.eup %1656  ;;  %v1580_v0 = vpack.c.bf16 %v1655_v60, %v1651_v54  ;;  %1682 = vpow2.f32 %v1502_v58  ;;  %v1503_v1 = vmul.f32 -1.442695, %v750_v59  ;;  %v752_v2 = vadd.f32 %v751_v62, %v2091_v23 }
 0x224   :  { %v1659_v3 = vpop.eup %1658  ;;  %1684 = vrcp.f32 %v1060_v61  ;;  %v1061_v4 = vadd.f32 1.0, %v1657_v63  ;;  %v753_v5 = vpop.f32.mrf.mxu1 }
 0x225   :  { %v1661_v6 = vpop.eup %1660  ;;  %1434 = vst [vmem:[#allocation8 + $0x10] sm:$0xff] %v1580_v0  ;;  %1686 = vpow2.f32 %v1503_v1  ;;  %v1504_v7 = vmul.f32 -1.442695, %v752_v2  ;;  %v754_v8 = vadd.f32 %v753_v5, %v2095_v39 }
 0x226   :  { %v1663_v9 = vpop.eup %1662  ;;  %1688 = vrcp.f32 %v1061_v4  ;;  %v1062_v10 = vadd.f32 1.0, %v1661_v6  ;;  %v757_v11 = vpop.f32.mrf.mxu1 }
 0x227   :  { %v1665_v12 = vpop.eup %1664  ;;  %v1581_v13 = vpack.c.bf16 %v1663_v9, %v1659_v3  ;;  %1690 = vpow2.f32 %v1504_v7  ;;  %v1505_v14 = vmul.f32 -1.442695, %v754_v8  ;;  %v758_v15 = vadd.f32 %v757_v11, %v2091_v23 }
 0x228   :  { %v1667_v16 = vpop.eup %1666  ;;  %1692 = vrcp.f32 %v1062_v10  ;;  %v1063_v17 = vadd.f32 1.0, %v1665_v12  ;;  %v759_v18 = vpop.f32.mrf.mxu1 }
 0x229   :  { %v1669_v19 = vpop.eup %1668  ;;  %1435 = vst [vmem:[#allocation8 + $0x18] sm:$0xff] %v1581_v13  ;;  %v1064_v20 = vadd.f32 1.0, %v1667_v16  ;;  %1694 = vpow2.f32 %v1505_v14  ;;  %v1506_v21 = vmul.f32 -1.442695, %v758_v15  ;;  %v760_v22 = vadd.f32 %v759_v18, %v2095_v39 }
 0x22a   :  { %v1671_v38 = vpop.eup %1670  ;;  %1696 = vrcp.f32 %v1063_v17  ;;  %v761_v24 = vpop.f32.mrf.mxu1 }
 0x22b   :  { %v1673_v25 = vpop.eup %1672  ;;  %1698 = vrcp.f32 %v1064_v20  ;;  %v1065_v26 = vadd.f32 1.0, %v1671_v38  ;;  %v1507_v27 = vmul.f32 -1.442695, %v760_v22  ;;  %v762_v28 = vadd.f32 %v761_v24, %v2091_v23 }
 0x22c   :  { %v1675_v29 = vpop.eup %1674  ;;  %v1582_v30 = vpack.c.bf16 %v1673_v25, %v1669_v19  ;;  %1700 = vpow2.f32 %v1506_v21  ;;  %v763_v31 = vpop.f32.mrf.mxu1 }
 0x22d   :  { %v1677_v35 = vpop.eup %1676  ;;  %1702 = vrcp.f32 %v1065_v26  ;;  %v1066_v32 = vadd.f32 1.0, %v1675_v29  ;;  %v1508_v33 = vmul.f32 -1.442695, %v762_v28  ;;  %v764_v34 = vadd.f32 %v763_v31, %v2095_v39 }
 0x22e   :  { %v1679_v36 = vpop.eup %1678  ;;  %1436 = vst [vmem:[#allocation8 + $0x20] sm:$0xff] %v1582_v30  ;;  %1704 = vpow2.f32 %v1507_v27  ;;  %v767_v37 = vpop.f32.mrf.mxu1 }
 0x22f   :  { %v1681_v40 = vpop.eup %1680  ;;  %1706 = vrcp.f32 %v1066_v32  ;;  %v1067_v41 = vadd.f32 1.0, %v1679_v36  ;;  %v1509_v42 = vmul.f32 -1.442695, %v764_v34  ;;  %v768_v43 = vadd.f32 %v767_v37, %v2091_v23 }
 0x230   :  { %v1683_v44 = vpop.eup %1682  ;;  %v1583_v45 = vpack.c.bf16 %v1681_v40, %v1677_v35  ;;  %1708 = vpow2.f32 %v1508_v33  ;;  %v769_v46 = vpop.f32.mrf.mxu1 }
 0x231   :  { %v1685_v47 = vpop.eup %1684  ;;  %1710 = vrcp.f32 %v1067_v41  ;;  %v1068_v48 = vadd.f32 1.0, %v1683_v44  ;;  %v1510_v49 = vmul.f32 -1.442695, %v768_v43  ;;  %v770_v50 = vadd.f32 %v769_v46, %v2095_v39 }
 0x232   :  { %v1687_v51 = vpop.eup %1686  ;;  %1437 = vst [vmem:[#allocation8 + $0x28] sm:$0xff] %v1583_v45  ;;  %1712 = vpow2.f32 %v1509_v42  ;;  %v771_v52 = vpop.f32.mrf.mxu1 }
 0x233   :  { %v1689_v53 = vpop.eup %1688  ;;  %1714 = vrcp.f32 %v1068_v48  ;;  %v1069_v54 = vadd.f32 1.0, %v1687_v51  ;;  %v1511_v55 = vmul.f32 -1.442695, %v770_v50  ;;  %v772_v56 = vadd.f32 %v771_v52, %v2091_v23 }
 0x234   :  { %v1691_v57 = vpop.eup %1690  ;;  %v1584_v58 = vpack.c.bf16 %v1689_v53, %v1685_v47  ;;  %1716 = vpow2.f32 %v1510_v49  ;;  %v773_v59 = vpop.f32.mrf.mxu1 }
 0x235   :  { %v1693_v60 = vpop.eup %1692  ;;  %1718 = vrcp.f32 %v1069_v54  ;;  %v1070_v61 = vadd.f32 1.0, %v1691_v57  ;;  %v1512_v62 = vmul.f32 -1.442695, %v772_v56  ;;  %v774_v63 = vadd.f32 %v773_v59, %v2095_v39 }
 0x236   :  { %v1695_v0 = vpop.eup %1694  ;;  %1438 = vst [vmem:[#allocation8 + $0x30] sm:$0xff] %v1584_v58  ;;  %1720 = vpow2.f32 %v1511_v55  ;;  %v777_v1 = vpop.f32.mrf.mxu1 }
 0x237   :  { %v1697_v2 = vpop.eup %1696  ;;  %1722 = vrcp.f32 %v1070_v61  ;;  %v1071_v3 = vadd.f32 1.0, %v1695_v0  ;;  %v1513_v4 = vmul.f32 -1.442695, %v774_v63  ;;  %v778_v5 = vadd.f32 %v777_v1, %v2091_v23 }
 0x238   :  { %v1699_v6 = vpop.eup %1698  ;;  %v1585_v7 = vpack.c.bf16 %v1697_v2, %v1693_v60  ;;  %1724 = vpow2.f32 %v1512_v62  ;;  %v779_v8 = vpop.f32.mrf.mxu1 }
 0x239   :  { %v1701_v9 = vpop.eup %1700  ;;  %1726 = vrcp.f32 %v1071_v3  ;;  %v1514_v10 = vmul.f32 -1.442695, %v778_v5  ;;  %v780_v11 = vadd.f32 %v779_v8, %v2095_v39 }
 0x23a   :  { %v1703_v12 = vpop.eup %1702  ;;  %1439 = vst [vmem:[#allocation8 + $0x38] sm:$0xff] %v1585_v7  ;;  %v1072_v13 = vadd.f32 1.0, %v1701_v9  ;;  %1728 = vpow2.f32 %v1513_v4  ;;  %v781_v14 = vpop.f32.mrf.mxu1 }
 0x23b   :  { %v1705_v15 = vpop.eup %1704  ;;  %v1586_v16 = vpack.c.bf16 %v1703_v12, %v1699_v6  ;;  %1730 = vpow2.f32 %v1514_v10  ;;  %v1515_v17 = vmul.f32 -1.442695, %v780_v11  ;;  %v782_v18 = vadd.f32 %v781_v14, %v2091_v23 }
 0x23c   :  { %v1707_v19 = vpop.eup %1706  ;;  %1732 = vrcp.f32 %v1072_v13  ;;  %v1073_v20 = vadd.f32 1.0, %v1705_v15  ;;  %v783_v21 = vpop.f32.mrf.mxu1 }
 0x23d   :  { %v1709_v22 = vpop.eup %1708  ;;  %1440 = vst [vmem:[#allocation8 + $0x40] sm:$0xff] %v1586_v16  ;;  %1734 = vpow2.f32 %v1515_v17  ;;  %v1516_v38 = vmul.f32 -1.442695, %v782_v18  ;;  %v784_v24 = vadd.f32 %v783_v21, %v2095_v39 }
 0x23e   :  { %v1711_v25 = vpop.eup %1710  ;;  %1736 = vrcp.f32 %v1073_v20  ;;  %v1074_v26 = vadd.f32 1.0, %v1709_v22  ;;  %v787_v27 = vpop.f32.mrf.mxu1 }
 0x23f   :  { %v1713_v28 = vpop.eup %1712  ;;  %v1587_v29 = vpack.c.bf16 %v1711_v25, %v1707_v19  ;;  %1738 = vpow2.f32 %v1516_v38  ;;  %v1517_v30 = vmul.f32 -1.442695, %v784_v24  ;;  %v788_v31 = vadd.f32 %v787_v27, %v2091_v23 }
 0x240   :  { %v1715_v35 = vpop.eup %1714  ;;  %1740 = vrcp.f32 %v1074_v26  ;;  %v1075_v32 = vadd.f32 1.0, %v1713_v28  ;;  %v789_v33 = vpop.f32.mrf.mxu1 }
 0x241   :  { %v1717_v34 = vpop.eup %1716  ;;  %1441 = vst [vmem:[#allocation8 + $0x48] sm:$0xff] %v1587_v29  ;;  %1742 = vpow2.f32 %v1517_v30  ;;  %v1518_v36 = vmul.f32 -1.442695, %v788_v31  ;;  %v790_v37 = vadd.f32 %v789_v33, %v2095_v39 }
 0x242   :  { %v1719_v40 = vpop.eup %1718  ;;  %1744 = vrcp.f32 %v1075_v32  ;;  %v1076_v41 = vadd.f32 1.0, %v1717_v34  ;;  %v791_v42 = vpop.f32.mrf.mxu1 }
 0x243   :  { %v1721_v43 = vpop.eup %1720  ;;  %v1588_v44 = vpack.c.bf16 %v1719_v40, %v1715_v35  ;;  %1746 = vpow2.f32 %v1518_v36  ;;  %v1519_v45 = vmul.f32 -1.442695, %v790_v37  ;;  %v792_v46 = vadd.f32 %v791_v42, %v2091_v23 }
 0x244   :  { %v1723_v47 = vpop.eup %1722  ;;  %1748 = vrcp.f32 %v1076_v41  ;;  %v1077_v48 = vadd.f32 1.0, %v1721_v43  ;;  %v793_v49 = vpop.f32.mrf.mxu1 }
 0x245   :  { %v1725_v50 = vpop.eup %1724  ;;  %1442 = vst [vmem:[#allocation8 + $0x50] sm:$0xff] %v1588_v44  ;;  %1750 = vpow2.f32 %v1519_v45  ;;  %v1520_v51 = vmul.f32 -1.442695, %v792_v46  ;;  %v794_v52 = vadd.f32 %v793_v49, %v2095_v39 }
 0x246   :  { %v1727_v53 = vpop.eup %1726  ;;  %1752 = vrcp.f32 %v1077_v48  ;;  %v1078_v54 = vadd.f32 1.0, %v1725_v50  ;;  %v797_v55 = vpop.f32.mrf.mxu1 }
 0x247   :  { %v1729_v56 = vpop.eup %1728  ;;  %v1589_v57 = vpack.c.bf16 %v1727_v53, %v1723_v47  ;;  %1754 = vpow2.f32 %v1520_v51  ;;  %v1521_v58 = vmul.f32 -1.442695, %v794_v52  ;;  %v798_v59 = vadd.f32 %v797_v55, %v2091_v23 }
 0x248   :  { %v1731_v60 = vpop.eup %1730  ;;  %1756 = vrcp.f32 %v1078_v54  ;;  %v1079_v61 = vadd.f32 1.0, %v1729_v56  ;;  %v799_v62 = vpop.f32.mrf.mxu1 }
 0x249   :  { %v1733_v63 = vpop.eup %1732  ;;  %1443 = vst [vmem:[#allocation8 + $0x58] sm:$0xff] %v1589_v57  ;;  %v1080_v0 = vadd.f32 1.0, %v1731_v60  ;;  %1758 = vpow2.f32 %v1521_v58  ;;  %v1522_v1 = vmul.f32 -1.442695, %v798_v59  ;;  %v800_v2 = vadd.f32 %v799_v62, %v2095_v39 }
 0x24a   :  { %v1735_v3 = vpop.eup %1734  ;;  %1760 = vrcp.f32 %v1079_v61  ;;  %v801_v4 = vpop.f32.mrf.mxu1 }
 0x24b   :  { %v1737_v5 = vpop.eup %1736  ;;  %1762 = vrcp.f32 %v1080_v0  ;;  %v1081_v6 = vadd.f32 1.0, %v1735_v3  ;;  %v1523_v7 = vmul.f32 -1.442695, %v800_v2  ;;  %v802_v8 = vadd.f32 %v801_v4, %v2091_v23 }
 0x24c   :  { %v1739_v9 = vpop.eup %1738  ;;  %v1590_v10 = vpack.c.bf16 %v1737_v5, %v1733_v63  ;;  %1764 = vpow2.f32 %v1522_v1  ;;  %v803_v11 = vpop.f32.mrf.mxu1 }
 0x24d   :  { %v1741_v12 = vpop.eup %1740  ;;  %1766 = vrcp.f32 %v1081_v6  ;;  %v1082_v13 = vadd.f32 1.0, %v1739_v9  ;;  %v1524_v14 = vmul.f32 -1.442695, %v802_v8  ;;  %v804_v15 = vadd.f32 %v803_v11, %v2095_v39 }
 0x24e   :  { %v1743_v16 = vpop.eup %1742  ;;  %1444 = vst [vmem:[#allocation8 + $0x60] sm:$0xff] %v1590_v10  ;;  %1768 = vpow2.f32 %v1523_v7  ;;  %v807_v17 = vpop.f32.mrf.mxu1 }
 0x24f   :  { %v1745_v18 = vpop.eup %1744  ;;  %1770 = vrcp.f32 %v1082_v13  ;;  %v1083_v19 = vadd.f32 1.0, %v1743_v16  ;;  %v1525_v20 = vmul.f32 -1.442695, %v804_v15  ;;  %v808_v21 = vadd.f32 %v807_v17, %v2091_v23 }
 0x250   :  { %v1747_v22 = vpop.eup %1746  ;;  %v1591_v38 = vpack.c.bf16 %v1745_v18, %v1741_v12  ;;  %1772 = vpow2.f32 %v1524_v14  ;;  %v809_v24 = vpop.f32.mrf.mxu1 }
 0x251   :  { %v1749_v25 = vpop.eup %1748  ;;  %1774 = vrcp.f32 %v1083_v19  ;;  %v1084_v26 = vadd.f32 1.0, %v1747_v22  ;;  %v1526_v27 = vmul.f32 -1.442695, %v808_v21  ;;  %v810_v28 = vadd.f32 %v809_v24, %v2095_v39 }
 0x252   :  { %v1751_v29 = vpop.eup %1750  ;;  %1445 = vst [vmem:[#allocation8 + $0x68] sm:$0xff] %v1591_v38  ;;  %1776 = vpow2.f32 %v1525_v20  ;;  %v811_v30 = vpop.f32.mrf.mxu1 }
 0x253   :  { %v1753_v31 = vpop.eup %1752  ;;  %1778 = vrcp.f32 %v1084_v26  ;;  %v1085_v35 = vadd.f32 1.0, %v1751_v29  ;;  %v1527_v32 = vmul.f32 -1.442695, %v810_v28  ;;  %v812_v33 = vadd.f32 %v811_v30, %v2091_v23 }
 0x254   :  { %v1755_v34 = vpop.eup %1754  ;;  %v1592_v36 = vpack.c.bf16 %v1753_v31, %v1749_v25  ;;  %1780 = vpow2.f32 %v1526_v27  ;;  %v813_v37 = vpop.f32.mrf.mxu1 }
 0x255   :  { %v1757_v40 = vpop.eup %1756  ;;  %1782 = vrcp.f32 %v1085_v35  ;;  %v1086_v41 = vadd.f32 1.0, %v1755_v34  ;;  %v1528_v42 = vmul.f32 -1.442695, %v812_v33  ;;  %v814_v43 = vadd.f32 %v813_v37, %v2095_v39 }
 0x256   :  { %v1759_v44 = vpop.eup %1758  ;;  %1446 = vst [vmem:[#allocation8 + $0x70] sm:$0xff] %v1592_v36  ;;  %1784 = vpow2.f32 %v1527_v32  ;;  %v817_v45 = vpop.f32.mrf.mxu1 }
 0x257   :  { %v1761_v46 = vpop.eup %1760  ;;  %1786 = vrcp.f32 %v1086_v41  ;;  %v1087_v47 = vadd.f32 1.0, %v1759_v44  ;;  %v1529_v48 = vmul.f32 -1.442695, %v814_v43  ;;  %v818_v49 = vadd.f32 %v817_v45, %v2091_v23 }
 0x258   :  { %v1763_v50 = vpop.eup %1762  ;;  %v1593_v51 = vpack.c.bf16 %v1761_v46, %v1757_v40  ;;  %1788 = vpow2.f32 %v1528_v42  ;;  %v819_v52 = vpop.f32.mrf.mxu1 }
 0x259   :  { %v1765_v53 = vpop.eup %1764  ;;  %1790 = vrcp.f32 %v1087_v47  ;;  %v1530_v54 = vmul.f32 -1.442695, %v818_v49  ;;  %v820_v55 = vadd.f32 %v819_v52, %v2095_v39 }
 0x25a   :  { %v1767_v56 = vpop.eup %1766  ;;  %1447 = vst [vmem:[#allocation8 + $0x78] sm:$0xff] %v1593_v51  ;;  %v1088_v57 = vadd.f32 1.0, %v1765_v53  ;;  %1792 = vpow2.f32 %v1529_v48  ;;  %v821_v58 = vpop.f32.mrf.mxu1 }
 0x25b   :  { %v1769_v59 = vpop.eup %1768  ;;  %v1594_v60 = vpack.c.bf16 %v1767_v56, %v1763_v50  ;;  %1794 = vpow2.f32 %v1530_v54  ;;  %v1531_v61 = vmul.f32 -1.442695, %v820_v55  ;;  %v822_v62 = vadd.f32 %v821_v58, %v2091_v23 }
 0x25c   :  { %v1771_v63 = vpop.eup %1770  ;;  %1796 = vrcp.f32 %v1088_v57  ;;  %v1089_v0 = vadd.f32 1.0, %v1769_v59  ;;  %v823_v1 = vpop.f32.mrf.mxu1 }
 0x25d   :  { %v1773_v2 = vpop.eup %1772  ;;  %1448 = vst [vmem:[#allocation8 + $0x80] sm:$0xff] %v1594_v60  ;;  %1798 = vpow2.f32 %v1531_v61  ;;  %v1532_v3 = vmul.f32 -1.442695, %v822_v62  ;;  %v824_v4 = vadd.f32 %v823_v1, %v2095_v39 }
 0x25e   :  { %v1775_v5 = vpop.eup %1774  ;;  %1800 = vrcp.f32 %v1089_v0  ;;  %v1090_v6 = vadd.f32 1.0, %v1773_v2  ;;  %v827_v7 = vpop.f32.mrf.mxu1 }
 0x25f   :  { %v1777_v8 = vpop.eup %1776  ;;  %v1595_v9 = vpack.c.bf16 %v1775_v5, %v1771_v63  ;;  %1802 = vpow2.f32 %v1532_v3  ;;  %v1533_v10 = vmul.f32 -1.442695, %v824_v4  ;;  %v828_v11 = vadd.f32 %v827_v7, %v2091_v23 }
 0x260   :  { %v1779_v12 = vpop.eup %1778  ;;  %1804 = vrcp.f32 %v1090_v6  ;;  %v1091_v13 = vadd.f32 1.0, %v1777_v8  ;;  %v829_v14 = vpop.f32.mrf.mxu1 }
 0x261   :  { %v1781_v15 = vpop.eup %1780  ;;  %1449 = vst [vmem:[#allocation8 + $0x88] sm:$0xff] %v1595_v9  ;;  %1806 = vpow2.f32 %v1533_v10  ;;  %v1534_v16 = vmul.f32 -1.442695, %v828_v11  ;;  %v830_v17 = vadd.f32 %v829_v14, %v2095_v39 }
 0x262   :  { %v1783_v18 = vpop.eup %1782  ;;  %1808 = vrcp.f32 %v1091_v13  ;;  %v1092_v19 = vadd.f32 1.0, %v1781_v15  ;;  %v831_v20 = vpop.f32.mrf.mxu1 }
 0x263   :  { %v1785_v21 = vpop.eup %1784  ;;  %v1596_v22 = vpack.c.bf16 %v1783_v18, %v1779_v12  ;;  %1810 = vpow2.f32 %v1534_v16  ;;  %v1535_v38 = vmul.f32 -1.442695, %v830_v17  ;;  %v832_v24 = vadd.f32 %v831_v20, %v2091_v23 }
 0x264   :  { %v1787_v25 = vpop.eup %1786  ;;  %1812 = vrcp.f32 %v1092_v19  ;;  %v1093_v26 = vadd.f32 1.0, %v1785_v21  ;;  %v833_v27 = vpop.f32.mrf.mxu1 }
 0x265   :  { %v1789_v28 = vpop.eup %1788  ;;  %1450 = vst [vmem:[#allocation8 + $0x90] sm:$0xff] %v1596_v22  ;;  %1814 = vpow2.f32 %v1535_v38  ;;  %v1536_v29 = vmul.f32 -1.442695, %v832_v24  ;;  %v834_v30 = vadd.f32 %v833_v27, %v2095_v39 }
 0x266   :  { %v1791_v31 = vpop.eup %1790  ;;  %1816 = vrcp.f32 %v1093_v26  ;;  %v1094_v35 = vadd.f32 1.0, %v1789_v28  ;;  %v837_v32 = vpop.f32.mrf.mxu1 }
 0x267   :  { %v1793_v33 = vpop.eup %1792  ;;  %v1597_v34 = vpack.c.bf16 %v1791_v31, %v1787_v25  ;;  %1818 = vpow2.f32 %v1536_v29  ;;  %v1537_v36 = vmul.f32 -1.442695, %v834_v30  ;;  %v838_v37 = vadd.f32 %v837_v32, %v2091_v23 }
 0x268   :  { %v1795_v40 = vpop.eup %1794  ;;  %1820 = vrcp.f32 %v1094_v35  ;;  %v1095_v41 = vadd.f32 1.0, %v1793_v33  ;;  %v839_v42 = vpop.f32.mrf.mxu1 }
 0x269   :  { %v1797_v43 = vpop.eup %1796  ;;  %1451 = vst [vmem:[#allocation8 + $0x98] sm:$0xff] %v1597_v34  ;;  %v1096_v44 = vadd.f32 1.0, %v1795_v40  ;;  %1822 = vpow2.f32 %v1537_v36  ;;  %v1538_v45 = vmul.f32 -1.442695, %v838_v37  ;;  %v840_v46 = vadd.f32 %v839_v42, %v2095_v39 }
 0x26a   :  { %v1799_v47 = vpop.eup %1798  ;;  %1824 = vrcp.f32 %v1095_v41  ;;  %v841_v48 = vpop.f32.mrf.mxu1 }
 0x26b   :  { %v1801_v49 = vpop.eup %1800  ;;  %1826 = vrcp.f32 %v1096_v44  ;;  %v1097_v50 = vadd.f32 1.0, %v1799_v47  ;;  %v1539_v51 = vmul.f32 -1.442695, %v840_v46  ;;  %v842_v52 = vadd.f32 %v841_v48, %v2091_v23 }
 0x26c   :  { %v1803_v53 = vpop.eup %1802  ;;  %v1598_v54 = vpack.c.bf16 %v1801_v49, %v1797_v43  ;;  %1828 = vpow2.f32 %v1538_v45  ;;  %v843_v55 = vpop.f32.mrf.mxu1 }
 0x26d   :  { %v1805_v56 = vpop.eup %1804  ;;  %1830 = vrcp.f32 %v1097_v50  ;;  %v1098_v57 = vadd.f32 1.0, %v1803_v53  ;;  %v1540_v58 = vmul.f32 -1.442695, %v842_v52  ;;  %v844_v59 = vadd.f32 %v843_v55, %v2095_v39 }
 0x26e   :  { %v1807_v60 = vpop.eup %1806  ;;  %1452 = vst [vmem:[#allocation8 + $0xa0] sm:$0xff] %v1598_v54  ;;  %1832 = vpow2.f32 %v1539_v51  ;;  %v847_v61 = vpop.f32.mrf.mxu1 }
 0x26f   :  { %v1809_v62 = vpop.eup %1808  ;;  %1834 = vrcp.f32 %v1098_v57  ;;  %v1099_v63 = vadd.f32 1.0, %v1807_v60  ;;  %v1541_v0 = vmul.f32 -1.442695, %v844_v59  ;;  %v848_v1 = vadd.f32 %v847_v61, %v2091_v23 }
 0x270   :  { %v1811_v2 = vpop.eup %1810  ;;  %v1599_v3 = vpack.c.bf16 %v1809_v62, %v1805_v56  ;;  %1836 = vpow2.f32 %v1540_v58  ;;  %v849_v4 = vpop.f32.mrf.mxu1 }
 0x271   :  { %v1813_v5 = vpop.eup %1812  ;;  %1838 = vrcp.f32 %v1099_v63  ;;  %v1100_v6 = vadd.f32 1.0, %v1811_v2  ;;  %v1542_v7 = vmul.f32 -1.442695, %v848_v1  ;;  %v850_v8 = vadd.f32 %v849_v4, %v2095_v39 }
 0x272   :  { %v1815_v9 = vpop.eup %1814  ;;  %1453 = vst [vmem:[#allocation8 + $0xa8] sm:$0xff] %v1599_v3  ;;  %1840 = vpow2.f32 %v1541_v0  ;;  %v851_v10 = vpop.f32.mrf.mxu1 }
 0x273   :  { %v1817_v11 = vpop.eup %1816  ;;  %1842 = vrcp.f32 %v1100_v6  ;;  %v1101_v12 = vadd.f32 1.0, %v1815_v9  ;;  %v1543_v13 = vmul.f32 -1.442695, %v850_v8  ;;  %v852_v14 = vadd.f32 %v851_v10, %v2091_v23 }
 0x274   :  { %v1819_v15 = vpop.eup %1818  ;;  %v1600_v16 = vpack.c.bf16 %v1817_v11, %v1813_v5  ;;  %1844 = vpow2.f32 %v1542_v7  ;;  %v853_v17 = vpop.f32.mrf.mxu1 }
 0x275   :  { %v1821_v18 = vpop.eup %1820  ;;  %1846 = vrcp.f32 %v1101_v12  ;;  %v1102_v19 = vadd.f32 1.0, %v1819_v15  ;;  %v1544_v20 = vmul.f32 -1.442695, %v852_v14  ;;  %v854_v21 = vadd.f32 %v853_v17, %v2095_v39 }
 0x276   :  { %v1823_v22 = vpop.eup %1822  ;;  %1454 = vst [vmem:[#allocation8 + $0xb0] sm:$0xff] %v1600_v16  ;;  %1848 = vpow2.f32 %v1543_v13 }
 0x277   :  { %v1825_v38 = vpop.eup %1824  ;;  %1850 = vrcp.f32 %v1102_v19  ;;  %v1103_v24 = vadd.f32 1.0, %v1823_v22  ;;  %v1545_v25 = vmul.f32 -1.442695, %v854_v21 }
 0x278   :  { %v1827_v26 = vpop.eup %1826  ;;  %v1601_v27 = vpack.c.bf16 %v1825_v38, %v1821_v18  ;;  %1852 = vpow2.f32 %v1544_v20 }
 0x279   :  { %v1829_v23 = vpop.eup %1828  ;;  %1854 = vrcp.f32 %v1103_v24 }
 0x27a   :  { %v1831_v28 = vpop.eup %1830  ;;  %1455 = vst [vmem:[#allocation8 + $0xb8] sm:$0xff] %v1601_v27  ;;  %v1104_v29 = vadd.f32 1.0, %v1829_v23  ;;  %1856 = vpow2.f32 %v1545_v25 }
 0x27b   :  { %v1833_v30 = vpop.eup %1832  ;;  %v1602_v31 = vpack.c.bf16 %v1831_v28, %v1827_v26 }
 0x27c   :  { %v1835_v35 = vpop.eup %1834  ;;  %v1105_v39 = vadd.f32 1.0, %v1833_v30  ;;  %1858 = vrcp.f32 %v1104_v29 }
 0x27d   :  { %v1837_v32 = vpop.eup %1836  ;;  %1456 = vst [vmem:[#allocation8 + $0xc0] sm:$0xff] %v1602_v31 }
 0x27e   :  { %v1839_v33 = vpop.eup %1838  ;;  %1860 = vrcp.f32 %v1105_v39  ;;  %v1106_v34 = vadd.f32 1.0, %v1837_v32 }
 0x27f   :  { %v1841_v36 = vpop.eup %1840  ;;  %v1603_v37 = vpack.c.bf16 %v1839_v33, %v1835_v35 }
 0x280   :  { %v1843_v40 = vpop.eup %1842  ;;  %v1107_v41 = vadd.f32 1.0, %v1841_v36  ;;  %1862 = vrcp.f32 %v1106_v34 }
 0x281   :  { %v1845_v42 = vpop.eup %1844  ;;  %1457 = vst [vmem:[#allocation8 + $0xc8] sm:$0xff] %v1603_v37 }
 0x282   :  { %v1847_v43 = vpop.eup %1846  ;;  %1864 = vrcp.f32 %v1107_v41  ;;  %v1108_v44 = vadd.f32 1.0, %v1845_v42 }
 0x283   :  { %v1849_v45 = vpop.eup %1848  ;;  %v1604_v46 = vpack.c.bf16 %v1847_v43, %v1843_v40 }
 0x284   :  { %v1851_v47 = vpop.eup %1850  ;;  %v1109_v48 = vadd.f32 1.0, %v1849_v45  ;;  %1866 = vrcp.f32 %v1108_v44 }
 0x285   :  { %v1853_v49 = vpop.eup %1852  ;;  %1458 = vst [vmem:[#allocation8 + $0xd0] sm:$0xff] %v1604_v46 }
 0x286   :  { %v1855_v50 = vpop.eup %1854  ;;  %1868 = vrcp.f32 %v1109_v48  ;;  %v1110_v51 = vadd.f32 1.0, %v1853_v49 }
 0x287   :  { %v1857_v52 = vpop.eup %1856  ;;  %v1605_v53 = vpack.c.bf16 %v1855_v50, %v1851_v47 }
 0x288   :  { %v1111_v54 = vadd.f32 1.0, %v1857_v52  ;;  %1870 = vrcp.f32 %v1110_v51 }
 0x289   :  { %1459 = vst [vmem:[#allocation8 + $0xd8] sm:$0xff] %v1605_v53  ;;  %v1859_v55 = vpop.eup %1858 }
 0x28a   :  { %1872 = vrcp.f32 %v1111_v54 }
 0x28b   :  { %v1861_v56 = vpop.eup %1860 }
 0x28c   :  { %v1606_v57 = vpack.c.bf16 %v1861_v56, %v1859_v55 }
 0x28d   :  { %v1863_v58 = vpop.eup %1862 }
 0x28e   :  { %1460 = vst [vmem:[#allocation8 + $0xe0] sm:$0xff] %v1606_v57 }
 0x28f   :  { %v1865_v59 = vpop.eup %1864 }
 0x290   :  { %v1607_v60 = vpack.c.bf16 %v1865_v59, %v1863_v58 }
 0x291   :  { %v1867_v61 = vpop.eup %1866 }
 0x292   :  { %1461 = vst [vmem:[#allocation8 + $0xe8] sm:$0xff] %v1607_v60 }
 0x293   :  { %v1869_v62 = vpop.eup %1868 }
 0x294   :  { %v1608_v63 = vpack.c.bf16 %v1869_v62, %v1867_v61 }
 0x295   :  { %v1871_v0 = vpop.eup %1870 }
 0x296   :  { %1462 = vst [vmem:[#allocation8 + $0xf0] sm:$0xff] %v1608_v63 }
 0x297   :  { %v1873_v1 = vpop.eup %1872 }
 0x298   :  { %v1609_v2 = vpack.c.bf16 %v1873_v1, %v1871_v0 }
 0x29a   :  { %1463 = vst [vmem:[#allocation8 + $0xf8] sm:$0xff] %v1609_v2 }
 0x29b   :  { %1945 = shalt.err (!%p1942_p5)
}
 0x29c   :  { %s1966_s12 = smov 128   ;;  %s1967_s13 = smov 8  }
 0x29d   :  { %1475 = dma.vmem_to_hbm [thread:$0]  %s1470_s10, 4096, %s2169_s5, [#allocation4], %s1966_s12, %s1966_s12, %s1967_s13  }
 0x29e   :  { %1958 = dma.done.wait [#allocation4], 4096  }
 0x29f   :  { %1959 = vsyncadd [#allocation4], 4294963200 }
 0x2a0   :  { %1479 = vsyncpa [#allocation3], 1 }
 0x2a1   :  { %1480 = vsyncpa [#allocation6], 1 }
 0x2a2   :  { %1481 = vsyncpa [#allocation4], 1 }

</bundles_post_ra>
